<compile_context>
chip_gen: v7x
topology: tpu7x:2x2x1
jax: 0.10.0
libtpu: 0.0.40
codegen_flags: <defaults>
</compile_context>

<pallas_src>
import functools

import numpy as np
import jax
import jax.numpy as jnp
from jax.experimental import pallas as pl
from jax.experimental.pallas import tpu as pltpu


# ------------------------------ fused kernel --------------------------------
#
# Row layout for all conv-stage activations inside a batch block of size `bt`:
#   row = h * bt + b        (h-major, batch fastest)
# Lane layouts:
#   x  stage : lane = g*14 + w                 (28)
#   y1 stage : lane = g*72 + co*12 + j         (144)
#   po stage : lane = g*36 + ci*6  + q         (72)
#   y2 stage : lane = g*64 + c2*4  + ow        (128)

def fused_forward_kernel(xe_ref, xo_ref,
                         m1_ref, b1_ref, e0_ref, e1_ref,
                         m2_ref, b2_ref,
                         cw1oh_ref, cb1_ref, cw2_ref, cb2_ref, cw3_ref, cb3_ref,
                         pw1_ref, pb1_ref, pw2_ref, pb2_ref, pw3_ref, pb3_ref,
                         o_ref,
                         po_ref, y2_ref,
                         *, bt):
    f32 = jnp.float32

    def dot(a, b):
        return jnp.dot(a, b, preferred_element_type=f32)

    # ---- conv1 (1->6, 3x3, both blocs fused) + ReLU + 2x2 maxpool ----------
    # xe holds even image rows (h = 0,2,...,12), xo odd rows (h = 1,...,13),
    # both as (7*bt, 28) with row = p*bt + b.
    xa = xe_ref[0:6 * bt, :]          # image rows 2p      (p = 0..5)
    xb = xo_ref[0:6 * bt, :]          # image rows 2p + 1
    xc = xe_ref[bt:7 * bt, :]         # image rows 2p + 2
    xd = xo_ref[bt:7 * bt, :]         # image rows 2p + 3

    m1_0, m1_1, m1_2 = m1_ref[0], m1_ref[1], m1_ref[2]      # (28, 144) each
    y1e = dot(xa, m1_0) + dot(xb, m1_1) + dot(xc, m1_2)     # conv rows 2p
    y1o = dot(xb, m1_0) + dot(xc, m1_1) + dot(xd, m1_2)     # conv rows 2p+1
    # relu(max(.,.) + bias) == maxpool over h of relu(conv + bias)
    hp = jnp.maximum(jnp.maximum(y1e, y1o) + b1_ref[...], 0.0)   # (6*bt, 144)

    # 2x2 pool along w: max of two constant column-selector matmuls.
    po_ref[...] = jnp.maximum(dot(hp, e0_ref[...]),
                              dot(hp, e1_ref[...]))              # (6*bt, 72)

    # ---- conv2 (6->16, 3x3, no activation) ---------------------------------
    y2 = dot(po_ref[0:4 * bt, :], m2_ref[0])
    y2 = y2 + dot(po_ref[bt:5 * bt, :], m2_ref[1])
    y2 = y2 + dot(po_ref[2 * bt:6 * bt, :], m2_ref[2])
    y2_ref[...] = y2 + b2_ref[...]                               # (4*bt, 128)

    # ---- classification1/2 fused block-diagonally; flatten folded into FC1 -
    h1 = dot(y2_ref[0:bt, :], cw1oh_ref[0])
    h1 = h1 + dot(y2_ref[bt:2 * bt, :], cw1oh_ref[1])
    h1 = h1 + dot(y2_ref[2 * bt:3 * bt, :], cw1oh_ref[2])
    h1 = h1 + dot(y2_ref[3 * bt:4 * bt, :], cw1oh_ref[3])
    h1 = jnp.maximum(h1 + cb1_ref[...], 0.0)                     # (bt, 240)
    h2 = jnp.maximum(dot(h1, cw2_ref[...]) + cb2_ref[...], 0.0)  # (bt, 168)
    o12 = dot(h2, cw3_ref[...]) + cb3_ref[...]                   # (bt, 20)

    # ---- compare head 20 -> 12 -> 8 -> 2 -----------------------------------
    c1 = jnp.maximum(dot(o12, pw1_ref[...]) + pb1_ref[...], 0.0)
    c2 = jnp.maximum(dot(c1, pw2_ref[...]) + pb2_ref[...], 0.0)
    o_ref[...] = (dot(c2, pw3_ref[...]) + pb3_ref[...]).astype(o_ref.dtype)


# --------------------------- host-side packing -------------------------------

def _block_diag(a, b):
    a, b = np.asarray(a, np.float32), np.asarray(b, np.float32)
    out = np.zeros((a.shape[0] + b.shape[0], a.shape[1] + b.shape[1]), np.float32)
    out[:a.shape[0], :a.shape[1]] = a
    out[a.shape[0]:, a.shape[1]:] = b
    return out


def pack_params(params):
    """One-time weight re-layout (dj-folding, block-diag fusion of the two
    blocs / classifiers, flatten folded into the first FC). Runs on host."""
    conv1 = [params["bloc1"][0], params["bloc2"][0]]   # (w (6,1,3,3), b (6,))
    conv2 = [params["bloc1"][1], params["bloc2"][1]]   # (w (16,6,3,3), b (16,))

    # conv1: m1[di, g*14 + (j+dj), g*72 + co*12 + j] = w_g[co,0,di,dj]
    m1 = np.zeros((3, 28, 144), np.float32)
    b1 = np.zeros((1, 144), np.float32)
    for g in range(2):
        w, b = np.asarray(conv1[g][0]), np.asarray(conv1[g][1])
        for di in range(3):
            for dj in range(3):
                for co in range(6):
                    for j in range(12):
                        m1[di, g * 14 + j + dj, g * 72 + co * 12 + j] = w[co, 0, di, dj]
        for co in range(6):
            b1[0, g * 72 + co * 12: g * 72 + (co + 1) * 12] = b[co]

    # 2x2 w-pool selectors: (144, 72), one 1 per output column.
    e0 = np.zeros((144, 72), np.float32)
    e1 = np.zeros((144, 72), np.float32)
    for g in range(2):
        for ci in range(6):
            for q in range(6):
                e0[g * 72 + ci * 12 + 2 * q, g * 36 + ci * 6 + q] = 1.0
                e1[g * 72 + ci * 12 + 2 * q + 1, g * 36 + ci * 6 + q] = 1.0

    # conv2: m2[di, g*36 + ci*6 + (ow+dj), g*64 + c2*4 + ow] = w_g[c2,ci,di,dj]
    m2 = np.zeros((3, 72, 128), np.float32)
    b2 = np.zeros((1, 128), np.float32)
    for g in range(2):
        w, b = np.asarray(conv2[g][0]), np.asarray(conv2[g][1])
        for di in range(3):
            for dj in range(3):
                for c2 in range(16):
                    for ci in range(6):
                        for ow in range(4):
                            m2[di, g * 36 + ci * 6 + ow + dj,
                               g * 64 + c2 * 4 + ow] = w[c2, ci, di, dj]
        for c2 in range(16):
            b2[0, g * 64 + c2 * 4: g * 64 + (c2 + 1) * 4] = b[c2]

    # Classification heads (torch flatten order (c2, oh, ow)), block-diag over g.
    (c1w1, c1b1), (c1w2, c1b2), (c1w3, c1b3) = params["classification1"]
    (c2w1, c2b1), (c2w2, c2b2), (c2w3, c2b3) = params["classification2"]
    cw1_full = np.zeros((512, 240), np.float32)
    cw1_full[:256, :120] = np.asarray(c1w1)
    cw1_full[256:, 120:] = np.asarray(c2w1)
    # Fold the flatten: cw1oh[oh, g*64 + c2*4 + ow, :] = cw1_full[g*256 + c2*16 + oh*4 + ow, :]
    cw1oh = np.zeros((4, 128, 240), np.float32)
    for oh in range(4):
        for g in range(2):
            for c2 in range(16):
                for ow in range(4):
                    cw1oh[oh, g * 64 + c2 * 4 + ow, :] = \
                        cw1_full[g * 256 + c2 * 16 + oh * 4 + ow, :]

    packed = {
        "m1": m1, "b1": b1, "e0": e0, "e1": e1, "m2": m2, "b2": b2,
        "cw1oh": cw1oh,
        "cb1": np.concatenate([np.asarray(c1b1), np.asarray(c2b1)])[None, :],
        "cw2": _block_diag(c1w2, c2w2),
        "cb2": np.concatenate([np.asarray(c1b2), np.asarray(c2b2)])[None, :],
        "cw3": _block_diag(c1w3, c2w3),
        "cb3": np.concatenate([np.asarray(c1b3), np.asarray(c2b3)])[None, :],
        "pw1": np.asarray(params["compare"][0][0]),
        "pb1": np.asarray(params["compare"][0][1])[None, :],
        "pw2": np.asarray(params["compare"][1][0]),
        "pb2": np.asarray(params["compare"][1][1])[None, :],
        "pw3": np.asarray(params["compare"][2][0]),
        "pb3": np.asarray(params["compare"][2][1])[None, :],
    }
    return {k: jnp.asarray(v, jnp.float32) for k, v in packed.items()}


# -------------------------------- forward -----------------------------------

_WEIGHT_ORDER = ("m1", "b1", "e0", "e1", "m2", "b2",
                 "cw1oh", "cb1", "cw2", "cb2", "cw3", "cb3",
                 "pw1", "pb1", "pw2", "pb2", "pw3", "pb3")


def forward(packed, x, *, block_b=64):
    """x: (B, 2, 14, 14) -- two stacked 1-channel 14x14 images per sample."""
    B = x.shape[0]
    if B <= block_b:
        bt, nb = B, 1
    else:
        bt = block_b          # keep block_b a multiple of 8 (sublane tiling)
        nb = -(-B // bt)
    Bp = bt * nb

    # Lane-dense, h-major, row-parity-split input presentation (host-side).
    xg = jnp.transpose(x, (0, 2, 1, 3)).reshape(B, 14, 28)   # [b, h, g*14+w]
    if Bp != B:
        xg = jnp.concatenate(
            [xg, jnp.zeros((Bp - B, 14, 28), xg.dtype)], axis=0)
    xg = xg.reshape(nb, bt, 14, 28)
    xe = jnp.transpose(xg[:, :, 0::2, :], (0, 2, 1, 3)).reshape(nb * 7 * bt, 28)
    xo = jnp.transpose(xg[:, :, 1::2, :], (0, 2, 1, 3)).reshape(nb * 7 * bt, 28)

    weights = [packed[k] for k in _WEIGHT_ORDER]

    def full_spec(arr):
        nd = arr.ndim
        return pl.BlockSpec(arr.shape, lambda n, _nd=nd: (0,) * _nd)

    in_specs = ([pl.BlockSpec((7 * bt, 28), lambda n: (n, 0)),
                 pl.BlockSpec((7 * bt, 28), lambda n: (n, 0))]
                + [full_spec(w) for w in weights])

    out = pl.pallas_call(
        functools.partial(fused_forward_kernel, bt=bt),
        out_shape=jax.ShapeDtypeStruct((Bp, 2), jnp.float32),
        grid=(nb,),
        in_specs=in_specs,
        out_specs=pl.BlockSpec((bt, 2), lambda n: (n, 0)),
        scratch_shapes=[
            pltpu.VMEM((6 * bt, 72), jnp.float32),    # pooled conv1 output
            pltpu.VMEM((4 * bt, 128), jnp.float32),   # conv2 output
        ],
        compiler_params=pltpu.CompilerParams(
            dimension_semantics=("parallel",)),
    )(xe, xo, *weights)
    return out[:B]


# --------------------------- pure-JAX reference ------------------------------

def reference_forward(params, x):
    hi = jax.lax.Precision.HIGHEST

    def conv2d(h, w, b):
        y = jax.lax.conv_general_dilated(
            h, w, window_strides=(1, 1), padding="VALID",
            dimension_numbers=("NCHW", "OIHW", "NCHW"), precision=hi)
        return y + b[None, :, None, None]

    def bloc(xg, p):
        (w1, b1), (w2, b2) = p
        y = jnp.maximum(conv2d(xg, w1, b1), 0.0)
        y = jax.lax.reduce_window(y, -jnp.inf, jax.lax.max,
                                  (1, 1, 2, 2), (1, 1, 2, 2), "VALID")
        y = conv2d(y, w2, b2)
        return y.reshape(y.shape[0], -1)

    def mlp(h, layers):
        for i, (w, b) in enumerate(layers):
            h = jnp.dot(h, w, precision=hi) + b
            if i + 1 < len(layers):
                h = jnp.maximum(h, 0.0)
        return h

    f1 = bloc(x[:, 0:1], params["bloc1"])
    f2 = bloc(x[:, 1:2], params["bloc2"])
    o1 = mlp(f1, params["classification1"])
    o2 = mlp(f2, params["classification2"])
    return mlp(jnp.concatenate([o1, o2], axis=1), params["compare"])


# --------------------------- deterministic params ---------------------------

def _linear(key, in_f, out_f):
    kw, kb = jax.random.split(key)
    return (jax.random.normal(kw, (in_f, out_f), jnp.float32) * 0.1,
            jax.random.normal(kb, (out_f,), jnp.float32) * 0.1)


def _conv(key, cout, cin, k):
    kw, kb = jax.random.split(key)
    return (jax.random.normal(kw, (cout, cin, k, k), jnp.float32) * 0.2,
            jax.random.normal(kb, (cout,), jnp.float32) * 0.2)


def init_params(key):
    keys = jax.random.split(key, 13)
    return {
        "bloc1": (_conv(keys[0], 6, 1, 3), _conv(keys[1], 16, 6, 3)),
        "bloc2": (_conv(keys[2], 6, 1, 3), _conv(keys[3], 16, 6, 3)),
        "classification1": (_linear(keys[4], 256, 120),
                            _linear(keys[5], 120, 84),
                            _linear(keys[6], 84, 10)),
        "classification2": (_linear(keys[7], 256, 120),
                            _linear(keys[8], 120, 84),
                            _linear(keys[9], 84, 10)),
        "compare": (_linear(keys[10], 20, 12),
                    _linear(keys[11], 12, 8),
                    _linear(keys[12], 8, 2)),
    }


if __name__ == "__main__":
    # (B, 2, 14, 14): the .view(-1, 256) flatten in the torch module implies
    # 14x14 inputs (14 -> conv 12 -> pool 6 -> conv 4; 16*4*4 = 256).
    key = jax.random.PRNGKey(0)
    x = jax.random.normal(key, (2, 2, 14, 14), jnp.float32)
    params = init_params(jax.random.PRNGKey(1))
    packed = pack_params(params)

    out = jax.jit(forward)(packed, x)
    out = jax.block_until_ready(out)
    assert out.shape == (2, 2) and out.dtype == jnp.float32

    # Layout-correctness smoke check against a pure-JAX reference (loose
    # tolerance to absorb MXU pass-precision differences).
    ref = reference_forward(params, x)
    np.testing.assert_allclose(np.asarray(out), np.asarray(ref),
                               rtol=2e-2, atol=2e-3)
    print("KERNEL_OK")
</pallas_src>

<mosaic_0001>
module attributes {stable_mosaic.version = 11 : i64} {
  func.func @fused_forward_kernel(%arg0: i32, %arg1: memref<14x28xf32, #tpu.memory_space<vmem>>, %arg2: memref<14x28xf32, #tpu.memory_space<vmem>>, %arg3: memref<3x28x144xf32, #tpu.memory_space<vmem>>, %arg4: memref<1x144xf32, #tpu.memory_space<vmem>>, %arg5: memref<144x72xf32, #tpu.memory_space<vmem>>, %arg6: memref<144x72xf32, #tpu.memory_space<vmem>>, %arg7: memref<3x72x128xf32, #tpu.memory_space<vmem>>, %arg8: memref<1x128xf32, #tpu.memory_space<vmem>>, %arg9: memref<4x128x240xf32, #tpu.memory_space<vmem>>, %arg10: memref<1x240xf32, #tpu.memory_space<vmem>>, %arg11: memref<240x168xf32, #tpu.memory_space<vmem>>, %arg12: memref<1x168xf32, #tpu.memory_space<vmem>>, %arg13: memref<168x20xf32, #tpu.memory_space<vmem>>, %arg14: memref<1x20xf32, #tpu.memory_space<vmem>>, %arg15: memref<20x12xf32, #tpu.memory_space<vmem>>, %arg16: memref<1x12xf32, #tpu.memory_space<vmem>>, %arg17: memref<12x8xf32, #tpu.memory_space<vmem>>, %arg18: memref<1x8xf32, #tpu.memory_space<vmem>>, %arg19: memref<8x2xf32, #tpu.memory_space<vmem>>, %arg20: memref<1x2xf32, #tpu.memory_space<vmem>>, %arg21: memref<2x2xf32, #tpu.memory_space<vmem>>, %arg22: memref<12x72xf32, #tpu.memory_space<vmem>>, %arg23: memref<8x128xf32, #tpu.memory_space<vmem>>) attributes {dimension_semantics = [#tpu.dimension_semantics<parallel>], iteration_bounds = array<i64: 1>, scalar_prefetch = 0 : i64, scratch_operands = 2 : i64, tpu.core_type = #tpu.core_type<tc>, window_params = [{transform_indices = @transform_0, window_bounds = array<i64: 14, 28>}, {transform_indices = @transform_1, window_bounds = array<i64: 14, 28>}, {pipeline_mode = #tpu.pipeline_mode<synchronous>, transform_indices = @transform_2, window_bounds = array<i64: 3, 28, 144>}, {pipeline_mode = #tpu.pipeline_mode<synchronous>, transform_indices = @transform_3, window_bounds = array<i64: 1, 144>}, {pipeline_mode = #tpu.pipeline_mode<synchronous>, transform_indices = @transform_4, window_bounds = array<i64: 144, 72>}, {pipeline_mode = #tpu.pipeline_mode<synchronous>, transform_indices = @transform_5, window_bounds = array<i64: 144, 72>}, {pipeline_mode = #tpu.pipeline_mode<synchronous>, transform_indices = @transform_6, window_bounds = array<i64: 3, 72, 128>}, {pipeline_mode = #tpu.pipeline_mode<synchronous>, transform_indices = @transform_7, window_bounds = array<i64: 1, 128>}, {pipeline_mode = #tpu.pipeline_mode<synchronous>, transform_indices = @transform_8, window_bounds = array<i64: 4, 128, 240>}, {pipeline_mode = #tpu.pipeline_mode<synchronous>, transform_indices = @transform_9, window_bounds = array<i64: 1, 240>}, {pipeline_mode = #tpu.pipeline_mode<synchronous>, transform_indices = @transform_10, window_bounds = array<i64: 240, 168>}, {pipeline_mode = #tpu.pipeline_mode<synchronous>, transform_indices = @transform_11, window_bounds = array<i64: 1, 168>}, {pipeline_mode = #tpu.pipeline_mode<synchronous>, transform_indices = @transform_12, window_bounds = array<i64: 168, 20>}, {pipeline_mode = #tpu.pipeline_mode<synchronous>, transform_indices = @transform_13, window_bounds = array<i64: 1, 20>}, {pipeline_mode = #tpu.pipeline_mode<synchronous>, transform_indices = @transform_14, window_bounds = array<i64: 20, 12>}, {pipeline_mode = #tpu.pipeline_mode<synchronous>, transform_indices = @transform_15, window_bounds = array<i64: 1, 12>}, {pipeline_mode = #tpu.pipeline_mode<synchronous>, transform_indices = @transform_16, window_bounds = array<i64: 12, 8>}, {pipeline_mode = #tpu.pipeline_mode<synchronous>, transform_indices = @transform_17, window_bounds = array<i64: 1, 8>}, {pipeline_mode = #tpu.pipeline_mode<synchronous>, transform_indices = @transform_18, window_bounds = array<i64: 8, 2>}, {pipeline_mode = #tpu.pipeline_mode<synchronous>, transform_indices = @transform_19, window_bounds = array<i64: 1, 2>}, {transform_indices = @transform_20, window_bounds = array<i64: 2, 2>}]} {
    %c0 = arith.constant 0 : index
    %c0_0 = arith.constant 0 : index
    %0 = vector.load %arg1[%c0, %c0_0] : memref<14x28xf32, #tpu.memory_space<vmem>>, vector<12x28xf32>
    %c0_1 = arith.constant 0 : index
    %c0_2 = arith.constant 0 : index
    %1 = vector.load %arg2[%c0_1, %c0_2] : memref<14x28xf32, #tpu.memory_space<vmem>>, vector<12x28xf32>
    %c2 = arith.constant 2 : index
    %c0_3 = arith.constant 0 : index
    %2 = vector.load %arg1[%c2, %c0_3] : memref<14x28xf32, #tpu.memory_space<vmem>>, vector<12x28xf32>
    %c2_4 = arith.constant 2 : index
    %c0_5 = arith.constant 0 : index
    %3 = vector.load %arg2[%c2_4, %c0_5] : memref<14x28xf32, #tpu.memory_space<vmem>>, vector<12x28xf32>
    %c0_6 = arith.constant 0 : index
    %c0_7 = arith.constant 0 : index
    %c0_8 = arith.constant 0 : index
    %4 = vector.load %arg3[%c0_6, %c0_7, %c0_8] : memref<3x28x144xf32, #tpu.memory_space<vmem>>, vector<1x28x144xf32>
    %5 = vector.shape_cast %4 : vector<1x28x144xf32> to vector<28x144xf32>
    %c1 = arith.constant 1 : index
    %c0_9 = arith.constant 0 : index
    %c0_10 = arith.constant 0 : index
    %6 = vector.load %arg3[%c1, %c0_9, %c0_10] : memref<3x28x144xf32, #tpu.memory_space<vmem>>, vector<1x28x144xf32>
    %7 = vector.shape_cast %6 : vector<1x28x144xf32> to vector<28x144xf32>
    %c2_11 = arith.constant 2 : index
    %c0_12 = arith.constant 0 : index
    %c0_13 = arith.constant 0 : index
    %8 = vector.load %arg3[%c2_11, %c0_12, %c0_13] : memref<3x28x144xf32, #tpu.memory_space<vmem>>, vector<1x28x144xf32>
    %9 = vector.shape_cast %8 : vector<1x28x144xf32> to vector<28x144xf32>
    %cst = arith.constant dense<0.000000e+00> : vector<12x144xf32>
    %10 = tpu.matmul %0, %5, %cst {dimension_numbers = #tpu.dot_dimension_numbers<[1], [0], [0], [1], [0, 0, 1, 1], [], []>} : vector<12x28xf32>, vector<28x144xf32>, vector<12x144xf32> -> vector<12x144xf32>
    %cst_14 = arith.constant dense<0.000000e+00> : vector<12x144xf32>
    %11 = tpu.matmul %1, %7, %cst_14 {dimension_numbers = #tpu.dot_dimension_numbers<[1], [0], [0], [1], [0, 0, 1, 1], [], []>} : vector<12x28xf32>, vector<28x144xf32>, vector<12x144xf32> -> vector<12x144xf32>
    %12 = arith.addf %10, %11 : vector<12x144xf32>
    %cst_15 = arith.constant dense<0.000000e+00> : vector<12x144xf32>
    %13 = tpu.matmul %2, %9, %cst_15 {dimension_numbers = #tpu.dot_dimension_numbers<[1], [0], [0], [1], [0, 0, 1, 1], [], []>} : vector<12x28xf32>, vector<28x144xf32>, vector<12x144xf32> -> vector<12x144xf32>
    %14 = arith.addf %12, %13 : vector<12x144xf32>
    %cst_16 = arith.constant dense<0.000000e+00> : vector<12x144xf32>
    %15 = tpu.matmul %1, %5, %cst_16 {dimension_numbers = #tpu.dot_dimension_numbers<[1], [0], [0], [1], [0, 0, 1, 1], [], []>} : vector<12x28xf32>, vector<28x144xf32>, vector<12x144xf32> -> vector<12x144xf32>
    %cst_17 = arith.constant dense<0.000000e+00> : vector<12x144xf32>
    %16 = tpu.matmul %2, %7, %cst_17 {dimension_numbers = #tpu.dot_dimension_numbers<[1], [0], [0], [1], [0, 0, 1, 1], [], []>} : vector<12x28xf32>, vector<28x144xf32>, vector<12x144xf32> -> vector<12x144xf32>
    %17 = arith.addf %15, %16 : vector<12x144xf32>
    %cst_18 = arith.constant dense<0.000000e+00> : vector<12x144xf32>
    %18 = tpu.matmul %3, %9, %cst_18 {dimension_numbers = #tpu.dot_dimension_numbers<[1], [0], [0], [1], [0, 0, 1, 1], [], []>} : vector<12x28xf32>, vector<28x144xf32>, vector<12x144xf32> -> vector<12x144xf32>
    %19 = arith.addf %17, %18 : vector<12x144xf32>
    %20 = arith.maximumf %14, %19 : vector<12x144xf32>
    %c0_19 = arith.constant 0 : index
    %c0_20 = arith.constant 0 : index
    %21 = vector.load %arg4[%c0_19, %c0_20] : memref<1x144xf32, #tpu.memory_space<vmem>>, vector<1x144xf32>
    %22 = vector.broadcast %21 : vector<1x144xf32> to vector<12x144xf32>
    %23 = arith.addf %20, %22 : vector<12x144xf32>
    %cst_21 = arith.constant 0.000000e+00 : f32
    %24 = vector.broadcast %cst_21 : f32 to vector<12x144xf32>
    %25 = arith.maximumf %23, %24 : vector<12x144xf32>
    %c0_22 = arith.constant 0 : index
    %c0_23 = arith.constant 0 : index
    %26 = vector.load %arg5[%c0_22, %c0_23] : memref<144x72xf32, #tpu.memory_space<vmem>>, vector<144x72xf32>
    %cst_24 = arith.constant dense<0.000000e+00> : vector<12x72xf32>
    %27 = tpu.matmul %25, %26, %cst_24 {dimension_numbers = #tpu.dot_dimension_numbers<[1], [0], [0], [1], [0, 0, 1, 1], [], []>} : vector<12x144xf32>, vector<144x72xf32>, vector<12x72xf32> -> vector<12x72xf32>
    %c0_25 = arith.constant 0 : index
    %c0_26 = arith.constant 0 : index
    %28 = vector.load %arg6[%c0_25, %c0_26] : memref<144x72xf32, #tpu.memory_space<vmem>>, vector<144x72xf32>
    %cst_27 = arith.constant dense<0.000000e+00> : vector<12x72xf32>
    %29 = tpu.matmul %25, %28, %cst_27 {dimension_numbers = #tpu.dot_dimension_numbers<[1], [0], [0], [1], [0, 0, 1, 1], [], []>} : vector<12x144xf32>, vector<144x72xf32>, vector<12x72xf32> -> vector<12x72xf32>
    %30 = arith.maximumf %27, %29 : vector<12x72xf32>
    %c0_28 = arith.constant 0 : index
    %c0_29 = arith.constant 0 : index
    %31 = vector.load %arg22[%c0_28, %c0_29] : memref<12x72xf32, #tpu.memory_space<vmem>>, vector<12x72xf32>
    tpu.vector_store %arg22[%c0_28, %c0_29], %30 {strides = array<i32>} : memref<12x72xf32, #tpu.memory_space<vmem>>, vector<12x72xf32>,
    %c0_30 = arith.constant 0 : index
    %c0_31 = arith.constant 0 : index
    %32 = vector.load %arg22[%c0_30, %c0_31] : memref<12x72xf32, #tpu.memory_space<vmem>>, vector<8x72xf32>
    %c0_32 = arith.constant 0 : index
    %c0_33 = arith.constant 0 : index
    %c0_34 = arith.constant 0 : index
    %33 = vector.load %arg7[%c0_32, %c0_33, %c0_34] : memref<3x72x128xf32, #tpu.memory_space<vmem>>, vector<1x72x128xf32>
    %34 = vector.shape_cast %33 : vector<1x72x128xf32> to vector<72x128xf32>
    %cst_35 = arith.constant dense<0.000000e+00> : vector<8x128xf32>
    %35 = tpu.matmul %32, %34, %cst_35 {dimension_numbers = #tpu.dot_dimension_numbers<[1], [0], [0], [1], [0, 0, 1, 1], [], []>} : vector<8x72xf32>, vector<72x128xf32>, vector<8x128xf32> -> vector<8x128xf32>
    %c2_36 = arith.constant 2 : index
    %c0_37 = arith.constant 0 : index
    %36 = vector.load %arg22[%c2_36, %c0_37] : memref<12x72xf32, #tpu.memory_space<vmem>>, vector<8x72xf32>
    %c1_38 = arith.constant 1 : index
    %c0_39 = arith.constant 0 : index
    %c0_40 = arith.constant 0 : index
    %37 = vector.load %arg7[%c1_38, %c0_39, %c0_40] : memref<3x72x128xf32, #tpu.memory_space<vmem>>, vector<1x72x128xf32>
    %38 = vector.shape_cast %37 : vector<1x72x128xf32> to vector<72x128xf32>
    %cst_41 = arith.constant dense<0.000000e+00> : vector<8x128xf32>
    %39 = tpu.matmul %36, %38, %cst_41 {dimension_numbers = #tpu.dot_dimension_numbers<[1], [0], [0], [1], [0, 0, 1, 1], [], []>} : vector<8x72xf32>, vector<72x128xf32>, vector<8x128xf32> -> vector<8x128xf32>
    %40 = arith.addf %35, %39 : vector<8x128xf32>
    %c4 = arith.constant 4 : index
    %c0_42 = arith.constant 0 : index
    %41 = vector.load %arg22[%c4, %c0_42] : memref<12x72xf32, #tpu.memory_space<vmem>>, vector<8x72xf32>
    %c2_43 = arith.constant 2 : index
    %c0_44 = arith.constant 0 : index
    %c0_45 = arith.constant 0 : index
    %42 = vector.load %arg7[%c2_43, %c0_44, %c0_45] : memref<3x72x128xf32, #tpu.memory_space<vmem>>, vector<1x72x128xf32>
    %43 = vector.shape_cast %42 : vector<1x72x128xf32> to vector<72x128xf32>
    %cst_46 = arith.constant dense<0.000000e+00> : vector<8x128xf32>
    %44 = tpu.matmul %41, %43, %cst_46 {dimension_numbers = #tpu.dot_dimension_numbers<[1], [0], [0], [1], [0, 0, 1, 1], [], []>} : vector<8x72xf32>, vector<72x128xf32>, vector<8x128xf32> -> vector<8x128xf32>
    %45 = arith.addf %40, %44 : vector<8x128xf32>
    %c0_47 = arith.constant 0 : index
    %c0_48 = arith.constant 0 : index
    %46 = vector.load %arg8[%c0_47, %c0_48] : memref<1x128xf32, #tpu.memory_space<vmem>>, vector<1x128xf32>
    %47 = vector.broadcast %46 : vector<1x128xf32> to vector<8x128xf32>
    %48 = arith.addf %45, %47 : vector<8x128xf32>
    %c0_49 = arith.constant 0 : index
    %c0_50 = arith.constant 0 : index
    %49 = vector.load %arg23[%c0_49, %c0_50] : memref<8x128xf32, #tpu.memory_space<vmem>>, vector<8x128xf32>
    tpu.vector_store %arg23[%c0_49, %c0_50], %48 {strides = array<i32>} : memref<8x128xf32, #tpu.memory_space<vmem>>, vector<8x128xf32>,
    %c0_51 = arith.constant 0 : index
    %c0_52 = arith.constant 0 : index
    %50 = vector.load %arg23[%c0_51, %c0_52] : memref<8x128xf32, #tpu.memory_space<vmem>>, vector<2x128xf32>
    %c0_53 = arith.constant 0 : index
    %c0_54 = arith.constant 0 : index
    %c0_55 = arith.constant 0 : index
    %51 = vector.load %arg9[%c0_53, %c0_54, %c0_55] : memref<4x128x240xf32, #tpu.memory_space<vmem>>, vector<1x128x240xf32>
    %52 = vector.shape_cast %51 : vector<1x128x240xf32> to vector<128x240xf32>
    %cst_56 = arith.constant dense<0.000000e+00> : vector<2x240xf32>
    %53 = tpu.matmul %50, %52, %cst_56 {dimension_numbers = #tpu.dot_dimension_numbers<[1], [0], [0], [1], [0, 0, 1, 1], [], []>} : vector<2x128xf32>, vector<128x240xf32>, vector<2x240xf32> -> vector<2x240xf32>
    %c2_57 = arith.constant 2 : index
    %c0_58 = arith.constant 0 : index
    %54 = vector.load %arg23[%c2_57, %c0_58] : memref<8x128xf32, #tpu.memory_space<vmem>>, vector<2x128xf32>
    %c1_59 = arith.constant 1 : index
    %c0_60 = arith.constant 0 : index
    %c0_61 = arith.constant 0 : index
    %55 = vector.load %arg9[%c1_59, %c0_60, %c0_61] : memref<4x128x240xf32, #tpu.memory_space<vmem>>, vector<1x128x240xf32>
    %56 = vector.shape_cast %55 : vector<1x128x240xf32> to vector<128x240xf32>
    %cst_62 = arith.constant dense<0.000000e+00> : vector<2x240xf32>
    %57 = tpu.matmul %54, %56, %cst_62 {dimension_numbers = #tpu.dot_dimension_numbers<[1], [0], [0], [1], [0, 0, 1, 1], [], []>} : vector<2x128xf32>, vector<128x240xf32>, vector<2x240xf32> -> vector<2x240xf32>
    %58 = arith.addf %53, %57 : vector<2x240xf32>
    %c4_63 = arith.constant 4 : index
    %c0_64 = arith.constant 0 : index
    %59 = vector.load %arg23[%c4_63, %c0_64] : memref<8x128xf32, #tpu.memory_space<vmem>>, vector<2x128xf32>
    %c2_65 = arith.constant 2 : index
    %c0_66 = arith.constant 0 : index
    %c0_67 = arith.constant 0 : index
    %60 = vector.load %arg9[%c2_65, %c0_66, %c0_67] : memref<4x128x240xf32, #tpu.memory_space<vmem>>, vector<1x128x240xf32>
    %61 = vector.shape_cast %60 : vector<1x128x240xf32> to vector<128x240xf32>
    %cst_68 = arith.constant dense<0.000000e+00> : vector<2x240xf32>
    %62 = tpu.matmul %59, %61, %cst_68 {dimension_numbers = #tpu.dot_dimension_numbers<[1], [0], [0], [1], [0, 0, 1, 1], [], []>} : vector<2x128xf32>, vector<128x240xf32>, vector<2x240xf32> -> vector<2x240xf32>
    %63 = arith.addf %58, %62 : vector<2x240xf32>
    %c6 = arith.constant 6 : index
    %c0_69 = arith.constant 0 : index
    %64 = vector.load %arg23[%c6, %c0_69] : memref<8x128xf32, #tpu.memory_space<vmem>>, vector<2x128xf32>
    %c3 = arith.constant 3 : index
    %c0_70 = arith.constant 0 : index
    %c0_71 = arith.constant 0 : index
    %65 = vector.load %arg9[%c3, %c0_70, %c0_71] : memref<4x128x240xf32, #tpu.memory_space<vmem>>, vector<1x128x240xf32>
    %66 = vector.shape_cast %65 : vector<1x128x240xf32> to vector<128x240xf32>
    %cst_72 = arith.constant dense<0.000000e+00> : vector<2x240xf32>
    %67 = tpu.matmul %64, %66, %cst_72 {dimension_numbers = #tpu.dot_dimension_numbers<[1], [0], [0], [1], [0, 0, 1, 1], [], []>} : vector<2x128xf32>, vector<128x240xf32>, vector<2x240xf32> -> vector<2x240xf32>
    %68 = arith.addf %63, %67 : vector<2x240xf32>
    %c0_73 = arith.constant 0 : index
    %c0_74 = arith.constant 0 : index
    %69 = vector.load %arg10[%c0_73, %c0_74] : memref<1x240xf32, #tpu.memory_space<vmem>>, vector<1x240xf32>
    %70 = vector.broadcast %69 : vector<1x240xf32> to vector<2x240xf32>
    %71 = arith.addf %68, %70 : vector<2x240xf32>
    %cst_75 = arith.constant 0.000000e+00 : f32
    %72 = vector.broadcast %cst_75 : f32 to vector<2x240xf32>
    %73 = arith.maximumf %71, %72 : vector<2x240xf32>
    %c0_76 = arith.constant 0 : index
    %c0_77 = arith.constant 0 : index
    %74 = vector.load %arg11[%c0_76, %c0_77] : memref<240x168xf32, #tpu.memory_space<vmem>>, vector<240x168xf32>
    %cst_78 = arith.constant dense<0.000000e+00> : vector<2x168xf32>
    %75 = tpu.matmul %73, %74, %cst_78 {dimension_numbers = #tpu.dot_dimension_numbers<[1], [0], [0], [1], [0, 0, 1, 1], [], []>} : vector<2x240xf32>, vector<240x168xf32>, vector<2x168xf32> -> vector<2x168xf32>
    %c0_79 = arith.constant 0 : index
    %c0_80 = arith.constant 0 : index
    %76 = vector.load %arg12[%c0_79, %c0_80] : memref<1x168xf32, #tpu.memory_space<vmem>>, vector<1x168xf32>
    %77 = vector.broadcast %76 : vector<1x168xf32> to vector<2x168xf32>
    %78 = arith.addf %75, %77 : vector<2x168xf32>
    %cst_81 = arith.constant 0.000000e+00 : f32
    %79 = vector.broadcast %cst_81 : f32 to vector<2x168xf32>
    %80 = arith.maximumf %78, %79 : vector<2x168xf32>
    %c0_82 = arith.constant 0 : index
    %c0_83 = arith.constant 0 : index
    %81 = vector.load %arg13[%c0_82, %c0_83] : memref<168x20xf32, #tpu.memory_space<vmem>>, vector<168x20xf32>
    %cst_84 = arith.constant dense<0.000000e+00> : vector<2x20xf32>
    %82 = tpu.matmul %80, %81, %cst_84 {dimension_numbers = #tpu.dot_dimension_numbers<[1], [0], [0], [1], [0, 0, 1, 1], [], []>} : vector<2x168xf32>, vector<168x20xf32>, vector<2x20xf32> -> vector<2x20xf32>
    %c0_85 = arith.constant 0 : index
    %c0_86 = arith.constant 0 : index
    %83 = vector.load %arg14[%c0_85, %c0_86] : memref<1x20xf32, #tpu.memory_space<vmem>>, vector<1x20xf32>
    %84 = vector.broadcast %83 : vector<1x20xf32> to vector<2x20xf32>
    %85 = arith.addf %82, %84 : vector<2x20xf32>
    %c0_87 = arith.constant 0 : index
    %c0_88 = arith.constant 0 : index
    %86 = vector.load %arg15[%c0_87, %c0_88] : memref<20x12xf32, #tpu.memory_space<vmem>>, vector<20x12xf32>
    %cst_89 = arith.constant dense<0.000000e+00> : vector<2x12xf32>
    %87 = tpu.matmul %85, %86, %cst_89 {dimension_numbers = #tpu.dot_dimension_numbers<[1], [0], [0], [1], [0, 0, 1, 1], [], []>} : vector<2x20xf32>, vector<20x12xf32>, vector<2x12xf32> -> vector<2x12xf32>
    %c0_90 = arith.constant 0 : index
    %c0_91 = arith.constant 0 : index
    %88 = vector.load %arg16[%c0_90, %c0_91] : memref<1x12xf32, #tpu.memory_space<vmem>>, vector<1x12xf32>
    %89 = vector.broadcast %88 : vector<1x12xf32> to vector<2x12xf32>
    %90 = arith.addf %87, %89 : vector<2x12xf32>
    %cst_92 = arith.constant 0.000000e+00 : f32
    %91 = vector.broadcast %cst_92 : f32 to vector<2x12xf32>
    %92 = arith.maximumf %90, %91 : vector<2x12xf32>
    %c0_93 = arith.constant 0 : index
    %c0_94 = arith.constant 0 : index
    %93 = vector.load %arg17[%c0_93, %c0_94] : memref<12x8xf32, #tpu.memory_space<vmem>>, vector<12x8xf32>
    %cst_95 = arith.constant dense<0.000000e+00> : vector<2x8xf32>
    %94 = tpu.matmul %92, %93, %cst_95 {dimension_numbers = #tpu.dot_dimension_numbers<[1], [0], [0], [1], [0, 0, 1, 1], [], []>} : vector<2x12xf32>, vector<12x8xf32>, vector<2x8xf32> -> vector<2x8xf32>
    %c0_96 = arith.constant 0 : index
    %c0_97 = arith.constant 0 : index
    %95 = vector.load %arg18[%c0_96, %c0_97] : memref<1x8xf32, #tpu.memory_space<vmem>>, vector<1x8xf32>
    %96 = vector.broadcast %95 : vector<1x8xf32> to vector<2x8xf32>
    %97 = arith.addf %94, %96 : vector<2x8xf32>
    %cst_98 = arith.constant 0.000000e+00 : f32
    %98 = vector.broadcast %cst_98 : f32 to vector<2x8xf32>
    %99 = arith.maximumf %97, %98 : vector<2x8xf32>
    %c0_99 = arith.constant 0 : index
    %c0_100 = arith.constant 0 : index
    %100 = vector.load %arg19[%c0_99, %c0_100] : memref<8x2xf32, #tpu.memory_space<vmem>>, vector<8x2xf32>
    %cst_101 = arith.constant dense<0.000000e+00> : vector<2x2xf32>
    %101 = tpu.matmul %99, %100, %cst_101 {dimension_numbers = #tpu.dot_dimension_numbers<[1], [0], [0], [1], [0, 0, 1, 1], [], []>} : vector<2x8xf32>, vector<8x2xf32>, vector<2x2xf32> -> vector<2x2xf32>
    %c0_102 = arith.constant 0 : index
    %c0_103 = arith.constant 0 : index
    %102 = vector.load %arg20[%c0_102, %c0_103] : memref<1x2xf32, #tpu.memory_space<vmem>>, vector<1x2xf32>
    %103 = vector.broadcast %102 : vector<1x2xf32> to vector<2x2xf32>
    %104 = arith.addf %101, %103 : vector<2x2xf32>
    %c0_104 = arith.constant 0 : index
    %c0_105 = arith.constant 0 : index
    %105 = vector.load %arg21[%c0_104, %c0_105] : memref<2x2xf32, #tpu.memory_space<vmem>>, vector<2x2xf32>
    tpu.vector_store %arg21[%c0_104, %c0_105], %104 {strides = array<i32>} : memref<2x2xf32, #tpu.memory_space<vmem>>, vector<2x2xf32>,
    return
  }
  func.func @transform_0(%arg0: i32) -> (i32, i32) {
    %c0_i32 = arith.constant 0 : i32
    %c0_i32_0 = arith.constant 0 : i32
    return %arg0, %c0_i32 : i32, i32
  }
  func.func @transform_1(%arg0: i32) -> (i32, i32) {
    %c0_i32 = arith.constant 0 : i32
    %c0_i32_0 = arith.constant 0 : i32
    return %arg0, %c0_i32 : i32, i32
  }
  func.func @transform_2(%arg0: i32) -> (i32, i32, i32) {
    %c0_i32 = arith.constant 0 : i32
    %c0_i32_0 = arith.constant 0 : i32
    %c0_i32_1 = arith.constant 0 : i32
    %c0_i32_2 = arith.constant 0 : i32
    return %c0_i32, %c0_i32_0, %c0_i32_1 : i32, i32, i32
  }
  func.func @transform_3(%arg0: i32) -> (i32, i32) {
    %c0_i32 = arith.constant 0 : i32
    %c0_i32_0 = arith.constant 0 : i32
    %c0_i32_1 = arith.constant 0 : i32
    return %c0_i32, %c0_i32_0 : i32, i32
  }
  func.func @transform_4(%arg0: i32) -> (i32, i32) {
    %c0_i32 = arith.constant 0 : i32
    %c0_i32_0 = arith.constant 0 : i32
    %c0_i32_1 = arith.constant 0 : i32
    return %c0_i32, %c0_i32_0 : i32, i32
  }
  func.func @transform_5(%arg0: i32) -> (i32, i32) {
    %c0_i32 = arith.constant 0 : i32
    %c0_i32_0 = arith.constant 0 : i32
    %c0_i32_1 = arith.constant 0 : i32
    return %c0_i32, %c0_i32_0 : i32, i32
  }
  func.func @transform_6(%arg0: i32) -> (i32, i32, i32) {
    %c0_i32 = arith.constant 0 : i32
    %c0_i32_0 = arith.constant 0 : i32
    %c0_i32_1 = arith.constant 0 : i32
    %c0_i32_2 = arith.constant 0 : i32
    return %c0_i32, %c0_i32_0, %c0_i32_1 : i32, i32, i32
  }
  func.func @transform_7(%arg0: i32) -> (i32, i32) {
    %c0_i32 = arith.constant 0 : i32
    %c0_i32_0 = arith.constant 0 : i32
    %c0_i32_1 = arith.constant 0 : i32
    return %c0_i32, %c0_i32_0 : i32, i32
  }
  func.func @transform_8(%arg0: i32) -> (i32, i32, i32) {
    %c0_i32 = arith.constant 0 : i32
    %c0_i32_0 = arith.constant 0 : i32
    %c0_i32_1 = arith.constant 0 : i32
    %c0_i32_2 = arith.constant 0 : i32
    return %c0_i32, %c0_i32_0, %c0_i32_1 : i32, i32, i32
  }
  func.func @transform_9(%arg0: i32) -> (i32, i32) {
    %c0_i32 = arith.constant 0 : i32
    %c0_i32_0 = arith.constant 0 : i32
    %c0_i32_1 = arith.constant 0 : i32
    return %c0_i32, %c0_i32_0 : i32, i32
  }
  func.func @transform_10(%arg0: i32) -> (i32, i32) {
    %c0_i32 = arith.constant 0 : i32
    %c0_i32_0 = arith.constant 0 : i32
    %c0_i32_1 = arith.constant 0 : i32
    return %c0_i32, %c0_i32_0 : i32, i32
  }
  func.func @transform_11(%arg0: i32) -> (i32, i32) {
    %c0_i32 = arith.constant 0 : i32
    %c0_i32_0 = arith.constant 0 : i32
    %c0_i32_1 = arith.constant 0 : i32
    return %c0_i32, %c0_i32_0 : i32, i32
  }
  func.func @transform_12(%arg0: i32) -> (i32, i32) {
    %c0_i32 = arith.constant 0 : i32
    %c0_i32_0 = arith.constant 0 : i32
    %c0_i32_1 = arith.constant 0 : i32
    return %c0_i32, %c0_i32_0 : i32, i32
  }
  func.func @transform_13(%arg0: i32) -> (i32, i32) {
    %c0_i32 = arith.constant 0 : i32
    %c0_i32_0 = arith.constant 0 : i32
    %c0_i32_1 = arith.constant 0 : i32
    return %c0_i32, %c0_i32_0 : i32, i32
  }
  func.func @transform_14(%arg0: i32) -> (i32, i32) {
    %c0_i32 = arith.constant 0 : i32
    %c0_i32_0 = arith.constant 0 : i32
    %c0_i32_1 = arith.constant 0 : i32
    return %c0_i32, %c0_i32_0 : i32, i32
  }
  func.func @transform_15(%arg0: i32) -> (i32, i32) {
    %c0_i32 = arith.constant 0 : i32
    %c0_i32_0 = arith.constant 0 : i32
    %c0_i32_1 = arith.constant 0 : i32
    return %c0_i32, %c0_i32_0 : i32, i32
  }
  func.func @transform_16(%arg0: i32) -> (i32, i32) {
    %c0_i32 = arith.constant 0 : i32
    %c0_i32_0 = arith.constant 0 : i32
    %c0_i32_1 = arith.constant 0 : i32
    return %c0_i32, %c0_i32_0 : i32, i32
  }
  func.func @transform_17(%arg0: i32) -> (i32, i32) {
    %c0_i32 = arith.constant 0 : i32
    %c0_i32_0 = arith.constant 0 : i32
    %c0_i32_1 = arith.constant 0 : i32
    return %c0_i32, %c0_i32_0 : i32, i32
  }
  func.func @transform_18(%arg0: i32) -> (i32, i32) {
    %c0_i32 = arith.constant 0 : i32
    %c0_i32_0 = arith.constant 0 : i32
    %c0_i32_1 = arith.constant 0 : i32
    return %c0_i32, %c0_i32_0 : i32, i32
  }
  func.func @transform_19(%arg0: i32) -> (i32, i32) {
    %c0_i32 = arith.constant 0 : i32
    %c0_i32_0 = arith.constant 0 : i32
    %c0_i32_1 = arith.constant 0 : i32
    return %c0_i32, %c0_i32_0 : i32, i32
  }
  func.func @transform_20(%arg0: i32) -> (i32, i32) {
    %c0_i32 = arith.constant 0 : i32
    %c0_i32_0 = arith.constant 0 : i32
    return %arg0, %c0_i32 : i32, i32
  }
}

</mosaic_0001>

<bundles_post_ra>
// kernel: forward.1
= control target key start
LH: loop header
LB: loop body
LE: loop exit
PB: predicated region body
PF: predicated region fallthrough
CT: control target
= control target key end

     0   :  { %s4005_s0 = inlined_call_operand.vmem [shape: f32[14,28], index: 0, kind: input, shape index: {}]   ;;  %s4006_s1 = inlined_call_operand.vmem [shape: f32[14,28], index: 1, kind: input, shape index: {}]   ;;  %s4007_s2 = inlined_call_operand.vmem [shape: f32[3,28,144], index: 2, kind: input, shape index: {}]   ;;  %s4008_s3 = inlined_call_operand.vmem [shape: f32[1,144], index: 3, kind: input, shape index: {}]   ;;  %s4009_s4 = inlined_call_operand.vmem [shape: f32[144,72], index: 4, kind: input, shape index: {}]   ;;  %s4010_s5 = inlined_call_operand.vmem [shape: f32[144,72], index: 5, kind: input, shape index: {}]   ;;  %s4011_s6 = inlined_call_operand.vmem [shape: f32[3,72,128], index: 6, kind: input, shape index: {}]   ;;  %s4012_s7 = inlined_call_operand.vmem [shape: f32[1,128], index: 7, kind: input, shape index: {}]   ;;  %s4013_s8 = inlined_call_operand.vmem [shape: f32[4,128,240], index: 8, kind: input, shape index: {}]   ;;  %s4014_s9 = inlined_call_operand.vmem [shape: f32[1,240], index: 9, kind: input, shape index: {}]   ;;  %s4015_s10 = inlined_call_operand.vmem [shape: f32[240,168], index: 10, kind: input, shape index: {}]   ;;  %s4016_s11 = inlined_call_operand.vmem [shape: f32[1,168], index: 11, kind: input, shape index: {}]   ;;  %s4017_s12 = inlined_call_operand.vmem [shape: f32[168,20], index: 12, kind: input, shape index: {}]   ;;  %s4018_s13 = inlined_call_operand.vmem [shape: f32[1,20], index: 13, kind: input, shape index: {}]   ;;  %s4019_s14 = inlined_call_operand.vmem [shape: f32[20,12], index: 14, kind: input, shape index: {}]   ;;  %s4020_s15 = inlined_call_operand.vmem [shape: f32[1,12], index: 15, kind: input, shape index: {}]   ;;  %s4021_s16 = inlined_call_operand.vmem [shape: f32[12,8], index: 16, kind: input, shape index: {}]   ;;  %s4022_s17 = inlined_call_operand.vmem [shape: f32[1,8], index: 17, kind: input, shape index: {}]   ;;  %s4023_s18 = inlined_call_operand.vmem [shape: f32[8,2], index: 18, kind: input, shape index: {}]   ;;  %s4024_s19 = inlined_call_operand.vmem [shape: f32[1,2], index: 19, kind: input, shape index: {}]   ;;  %s4025_s20 = inlined_call_operand.hbm [shape: f32[2,2], index: 20, kind: output, shape index: {}]  }
   0x1   :  { %4030 = sst [smem:[#allocation7_spill]] %s4005_s0 }
   0x2   :  { %4031 = sst [smem:[#allocation8_spill]] %s4006_s1 }
   0x3   :  { %4032 = sst [smem:[#allocation9_spill]] %s4007_s2 }
   0x4   :  { %4033 = sst [smem:[#allocation10_spill]] %s4008_s3 }
   0x5   :  { %4034 = sst [smem:[#allocation11_spill]] %s4009_s4 }
   0x6   :  { %s4035_s23 = sld [smem:[#allocation9_spill]]  ;;  %vm107_vm0 = vcmask 1043456   ;;  %v2783_v7 = vmov 0.0   ;;  %vm2784_vm1 = vmmov 1   ;;  %s4038_s24 = sld [smem:[#allocation8_spill]]  ;;  %vm100_vm3 = vcmask 228352  }
   0x7   :  { %178 = vmatprep.mubr.f32.mxu0 %v2783_v7  ;;  %437 = vmatprep.mubr.f32.mxu1 %v2783_v7  ;;  %vm2914_vm2 = vmpackc.low %vm107_vm0, %vm2784_vm1  ;;  %s4039_s3 = sld [smem:[#allocation7_spill]] }
   0xc   :  { %v2062_v0 = vld [vmem:[%s4035_s23 + $0x48] sm:$0xff]  ;;  %v2064_v1 = vld [vmem:[%s4035_s23 + $0x58] sm:$0xff]  ;;  %v2061_v2 = vld [vmem:[%s4035_s23 + $0x40] sm:$0xff] }
   0xd   :  { %v2357_v3 = vpack.c.bf16 %v2064_v1, %v2062_v0  ;;  %v2063_v4 = vld [vmem:[%s4035_s23 + $0x50] sm:$0xff]  ;;  %v2066_v5 = vld [vmem:[%s4035_s23 + $0x68] sm:$0xff]  ;;  %v2068_v6 = vld [vmem:[%s4035_s23 + $0x78] sm:$0xf] }
   0xe   :  { %v2359_v8 = vpack.c.bf16 %v2063_v4, %v2061_v2  ;;  %v2361_v9 = vpack.c.bf16 %v2068_v6, %v2066_v5  ;;  %v2065_v11 = vld [vmem:[%s4035_s23 + $0x60] sm:$0xff]  ;;  %v2067_v12 = vld [vmem:[%s4035_s23 + $0x70] sm:$0xf]  ;;  %v75_v13 = vld [vmem:[%s4035_s23 + $0x8] sm:$0xff] }
   0xf   :  { %2358 = vmatprep.subr.bf16.mxu0 %v2357_v3  ;;  %2388 = vmatprep.subr.bf16.mxu1 %v2357_v3  ;;  %v77_v14 = vld [vmem:[%s4035_s23 + $0x18] sm:$0xff]  ;;  %v2364_v15 = vpack.c.bf16 %v2067_v12, %v2065_v11  ;;  %v74_v17 = vld [vmem:[%s4035_s23] sm:$0xff]  ;;  %v76_v18 = vld [vmem:[%s4035_s23 + $0x10] sm:$0xff] }
  0x10   :  { %2360 = vmatpush1.bf16.msra.mxu0 %v2359_v8  ;;  %2390 = vmatpush1.bf16.msra.mxu1 %v2359_v8  ;;  %v2367_v16 = vpack.c.bf16 %v77_v14, %v75_v13  ;;  %v79_v19 = vld [vmem:[%s4035_s23 + $0x28] sm:$0xff]  ;;  %v81_v20 = vld [vmem:[%s4035_s23 + $0x38] sm:$0xf]  ;;  %v68_v21 = vld [vmem:[%s4038_s24] sm:$0xff]  ;;  %v2369_v23 = vpack.c.bf16 %v76_v18, %v74_v17 }
  0x11   :  { %2363 = vmatprep.subr.msk.bf16.mxu0 %vm2914_vm2, %v2361_v9  ;;  %2393 = vmatprep.subr.msk.bf16.mxu1 %vm2914_vm2, %v2361_v9  ;;  %v2956_v22 = vld [vmem:[%s4039_s3 + $0x2] sm:$0xff]  ;;  %v80_v25 = vld [vmem:[%s4035_s23 + $0x30] sm:$0xf]  ;;  %v2371_v26 = vpack.c.bf16 %v81_v20, %v79_v19  ;;  %v2072_v28 = vld [vmem:[%s4035_s23 + $0x98] sm:$0xff] }
  0x12   :  { %v78_v24 = vld [vmem:[%s4035_s23 + $0x20] sm:$0xff]  ;;  %v2070_v27 = vld [vmem:[%s4035_s23 + $0x88] sm:$0xff]  ;;  %v2071_v33 = vld [vmem:[%s4035_s23 + $0x90] sm:$0xff] }
  0x13   :  { %v69_v29 = vld [vmem:[%s4038_s24 + $0x8] sm:$0xf]  ;;  %v2374_v31 = vpack.c.bf16 %v80_v25, %v78_v24  ;;  %v2069_v32 = vld [vmem:[%s4035_s23 + $0x80] sm:$0xff]  ;;  %v2377_v34 = vpack.c.bf16 %v2072_v28, %v2070_v27  ;;  %v2076_v36 = vld [vmem:[%s4035_s23 + $0xb8] sm:$0xf] }
  0x14   :  { %2366 = vmatpush1.bf16.msk.msra.mxu0 %vm2914_vm2, %v2364_v15  ;;  %2396 = vmatpush1.bf16.msk.msra.mxu1 %vm2914_vm2, %v2364_v15  ;;  %v2979_v30 = vld [vmem:[%s4039_s3 + $0xa] sm:$0xf]  ;;  %v66_v37 = vld [vmem:[%s4039_s3] sm:$0xff]  ;;  %v2379_v38 = vpack.c.bf16 %v2071_v33, %v2069_v32  ;;  %v2075_v40 = vld [vmem:[%s4035_s23 + $0xb0] sm:$0xf] }
  0x15   :  { %2368 = vmatprep.subr.bf16.mxu0 %v2367_v16  ;;  %2398 = vmatprep.subr.bf16.mxu1 %v2367_v16  ;;  %v2074_v35 = vld [vmem:[%s4035_s23 + $0xa8] sm:$0xff]  ;;  %v2073_v39 = vld [vmem:[%s4035_s23 + $0xa0] sm:$0xff] }
  0x16   :  { %v2381_v41 = vpack.c.bf16 %v2076_v36, %v2074_v35  ;;  %v67_v42 = vld [vmem:[%s4039_s3 + $0x8] sm:$0xf]  ;;  %v2384_v43 = vpack.c.bf16 %v2075_v40, %v2073_v39 }
  0x17   :  { %2079 = vmatmul.mubr.msk.f32.vlgmr.msra.gmra.mrb[0].mxu0 %vm100_vm3, %v68_v21  ;;  %2091 = vmatmul.mubr.msk.f32.vlgmr.msra.gmra.mrb[0].mxu1 %vm100_vm3, %v2956_v22 }
  0x18   :  { %2370 = vmatpush1.bf16.msra.mxu0 %v2369_v23  ;;  %2400 = vmatpush1.bf16.msra.mxu1 %v2369_v23 }
  0x19   :  { %184 = vmatprep.mubr.f32.mxu0 %v2783_v7  ;;  %443 = vmatprep.mubr.f32.mxu1 %v2783_v7 }
  0x1a   :  { %2373 = vmatprep.subr.msk.bf16.mxu0 %vm2914_vm2, %v2371_v26  ;;  %2403 = vmatprep.subr.msk.bf16.mxu1 %vm2914_vm2, %v2371_v26 }
  0x1b   :  { %2080 = vmatmul.mubr.msk.f32.gmra.mrb[2].mxu0 %vm100_vm3, %v69_v29  ;;  %2092 = vmatmul.mubr.msk.f32.gmra.mrb[2].mxu1 %vm100_vm3, %v2979_v30 }
  0x1c   :  { %2376 = vmatpush1.bf16.msk.msra.mxu0 %vm2914_vm2, %v2374_v31  ;;  %2406 = vmatpush1.bf16.msk.msra.mxu1 %vm2914_vm2, %v2374_v31 }
  0x1d   :  { %267 = vmatprep.mubr.f32.mxu0 %v2783_v7  ;;  %514 = vmatprep.mubr.f32.mxu1 %v2783_v7 }
  0x1e   :  { %2378 = vmatprep.subr.bf16.mxu0 %v2377_v34  ;;  %2408 = vmatprep.subr.bf16.mxu1 %v2377_v34 }
  0x1f   :  { %2083 = vmatmul.mubr.msk.f32.vlgmr.msra.gmra.mrb[0].mxu0 %vm100_vm3, %v66_v37  ;;  %2095 = vmatmul.mubr.msk.f32.vlgmr.msra.gmra.mrb[0].mxu1 %vm100_vm3, %v68_v21 }
  0x20   :  { %2380 = vmatpush1.bf16.msra.mxu0 %v2379_v38  ;;  %2410 = vmatpush1.bf16.msra.mxu1 %v2379_v38 }
  0x21   :  { %25 = vsyncpa [#allocation5], 0  ;;  %273 = vmatprep.mubr.f32.mxu0 %v2783_v7  ;;  %520 = vmatprep.mubr.f32.mxu1 %v2783_v7  ;;  %s4040_s30 = sld [smem:[#allocation11_spill]]  ;;  %v738_v46 = vld [vmem:[%s4010_s5] sm:$0xff]  ;;  %v739_v47 = vld [vmem:[%s4010_s5 + $0x8] sm:$0xff]  ;;  %v2785_v52 = vmov 0.0|0.0   ;;  %v620_v39 = vlaneseq }
  0x22   :  { %2383 = vmatprep.subr.msk.bf16.mxu0 %vm2914_vm2, %v2381_v41  ;;  %2413 = vmatprep.subr.msk.bf16.mxu1 %vm2914_vm2, %v2381_v41  ;;  %v72_v48 = vld [vmem:[%s4038_s24 + $0x2] sm:$0xff]  ;;  %v2445_v50 = vpack.c.bf16 %v739_v47, %v738_v46  ;;  %v740_v54 = vld [vmem:[%s4010_s5 + $0x10] sm:$0xff]  ;;  %v741_v55 = vld [vmem:[%s4010_s5 + $0x18] sm:$0xff]  ;;  %s4041_s25 = sld [smem:[#allocation10_spill]]  ;;  %vm656_vm4 = vcmask 130048   ;;  %vm2786_vm5 = vmmov 0  }
  0x23   :  { %2084 = vmatmul.mubr.msk.f32.gmra.mrb[2].mxu0 %vm100_vm3, %v67_v42  ;;  %2096 = vmatmul.mubr.msk.f32.gmra.mrb[2].mxu1 %vm100_vm3, %v69_v29  ;;  %v73_v56 = vld [vmem:[%s4038_s24 + $0xa] sm:$0xf]  ;;  %v2448_v58 = vpack.c.bf16 %v741_v55, %v740_v54  ;;  %v742_v61 = vld [vmem:[%s4010_s5 + $0x20] sm:$0xff]  ;;  %v744_v3 = vld [vmem:[%s4010_s5 + $0x30] sm:$0xff]  ;;  %v621_v40 = vshrl.u32 %v620_v39, 7  ;;  %vm833_vm6 = vcmask 588800  }
  0x24   :  { %2386 = vmatpush1.bf16.msk.msra.mxu0 %vm2914_vm2, %v2384_v43  ;;  %2416 = vmatpush1.bf16.msk.msra.mxu1 %vm2914_vm2, %v2384_v43  ;;  %v743_v62 = vld [vmem:[%s4010_s5 + $0x28] sm:$0xff]  ;;  %v745_v4 = vld [vmem:[%s4010_s5 + $0x38] sm:$0xff]  ;;  %v746_v11 = vld [vmem:[%s4010_s5 + $0x40] sm:$0xff]  ;;  %vm835_vm7 = vcmask 584704   ;;  %vm1609_vm8 = vcmask 916480   ;;  %vm1714_vm9 = vcmask 326656  }
  0x25   :  { %356 = vmatprep.mubr.f32.mxu0 %v2783_v7  ;;  %597 = vmatprep.mubr.f32.mxu1 %v2783_v7  ;;  %v2451_v0 = vpack.c.bf16 %v743_v62, %v742_v61  ;;  %v2454_v6 = vpack.c.bf16 %v745_v4, %v744_v3  ;;  %v747_v12 = vld [vmem:[%s4010_s5 + $0x48] sm:$0xff]  ;;  %v748_v17 = vld [vmem:[%s4010_s5 + $0x50] sm:$0xff]  ;;  %v749_v18 = vld [vmem:[%s4010_s5 + $0x58] sm:$0xff]  ;;  %v3178_v41 = vsub.s32 0, %v621_v40  ;;  %v3183_v43 = vsub.s32 1, %v621_v40  ;;  %s2787_s21 = smov [#allocation4]  }
  0x26   :  { %2417 = vmatprep.subr.bf16.mxu0 %v2785_v52  ;;  %2444 = vmatprep.subr.bf16.mxu1 %v2785_v52  ;;  %v2457_v14 = vpack.c.bf16 %v747_v12, %v746_v11  ;;  %v2460_v20 = vpack.c.bf16 %v749_v18, %v748_v17  ;;  %v750_v23 = vld [vmem:[%s4010_s5 + $0x60] sm:$0xff]  ;;  %v751_v24 = vld [vmem:[%s4010_s5 + $0x68] sm:$0xff]  ;;  %v752_v29 = vld [vmem:[%s4010_s5 + $0x70] sm:$0xff]  ;;  %vm1798_vm10 = vcmask 162816   ;;  %vm1885_vm11 = vcmask 97280   ;;  %s2053_s3 = sshll.u32 %s2787_s21, 4  ;;  %s2054_s3 = int_to_ptr.vmem [resolvable:$true] %s2053_s3 }
  0x27   :  { %v638_v44 = vld [vmem:[%s4040_s30] sm:$0xff]  ;;  %v639_v45 = vld [vmem:[%s4040_s30 + $0x8] sm:$0xff]  ;;  %v640_v51 = vld [vmem:[%s4040_s30 + $0x10] sm:$0xff]  ;;  %2087 = vmatmul.mubr.msk.f32.vlgmr.msra.gmra.mrb[0].mxu0 %vm100_vm3, %v2956_v22  ;;  %2099 = vmatmul.mubr.msk.f32.vlgmr.msra.gmra.mrb[0].mxu1 %vm100_vm3, %v72_v48  ;;  %v2463_v26 = vpack.c.bf16 %v751_v24, %v750_v23  ;;  %vm1971_vm12 = vcmask 64512   ;;  %vm2045_vm13 = vcmask 9216   ;;  %p2764_p1 = scmp.lt.s32.totalorder %s2054_s3, %s2054_s3 }
  0x28   :  { %v2418_v49 = vpack.c.bf16 %v639_v45, %v638_v44  ;;  %v641_v53 = vld [vmem:[%s4040_s30 + $0x18] sm:$0xff]  ;;  %362 = vmatprep.mubr.f32.mxu0 %v2783_v7  ;;  %603 = vmatprep.mubr.f32.mxu1 %v2783_v7  ;;  %v642_v59 = vld [vmem:[%s4040_s30 + $0x20] sm:$0xff]  ;;  %v643_v60 = vld [vmem:[%s4040_s30 + $0x28] sm:$0xff] }
  0x29   :  { %2446 = vmatpush1.bf16.msra.mxu1 %v2445_v50  ;;  %v2421_v57 = vpack.c.bf16 %v641_v53, %v640_v51  ;;  %v2424_v63 = vpack.c.bf16 %v643_v60, %v642_v59  ;;  %v644_v1 = vld [vmem:[%s4040_s30 + $0x30] sm:$0xff]  ;;  %v645_v2 = vld [vmem:[%s4040_s30 + $0x38] sm:$0xff]  ;;  %v646_v8 = vld [vmem:[%s4040_s30 + $0x40] sm:$0xff] }
  0x2a   :  { %2419 = vmatpush1.bf16.msra.mxu0 %v2418_v49  ;;  %2447 = vmatprep.subr.bf16.mxu1 %v2785_v52  ;;  %v2427_v5 = vpack.c.bf16 %v645_v2, %v644_v1  ;;  %v647_v9 = vld [vmem:[%s4040_s30 + $0x48] sm:$0xff]  ;;  %v648_v15 = vld [vmem:[%s4040_s30 + $0x50] sm:$0xff]  ;;  %v649_v16 = vld [vmem:[%s4040_s30 + $0x58] sm:$0xff] }
  0x2b   :  { %2420 = vmatprep.subr.bf16.mxu0 %v2785_v52  ;;  %2088 = vmatmul.mubr.msk.f32.gmra.mrb[2].mxu0 %vm100_vm3, %v2979_v30  ;;  %v2430_v13 = vpack.c.bf16 %v647_v9, %v646_v8  ;;  %v2433_v19 = vpack.c.bf16 %v649_v16, %v648_v15  ;;  %v650_v21 = vld [vmem:[%s4040_s30 + $0x60] sm:$0xff]  ;;  %v651_v22 = vld [vmem:[%s4040_s30 + $0x68] sm:$0xff]  ;;  %v652_v27 = vld [vmem:[%s4040_s30 + $0x70] sm:$0xff] }
  0x2c   :  { %2100 = vmatmul.mubr.msk.f32.gmra.mrb[2].mxu1 %vm100_vm3, %v73_v56  ;;  %v2436_v25 = vpack.c.bf16 %v651_v22, %v650_v21  ;;  %v653_v28 = vld [vmem:[%s4040_s30 + $0x78] sm:$0xff]  ;;  %v654_v33 = vld [vmem:[%s4040_s30 + $0x80] sm:$0xff]  ;;  %v655_v34 = vld [vmem:[%s4040_s30 + $0x88] sm:$0xff] }
  0x2d   :  { %2449 = vmatpush1.bf16.msra.mxu1 %v2448_v58  ;;  %v2439_v30 = vpack.c.bf16 %v653_v28, %v652_v27  ;;  %v753_v31 = vld [vmem:[%s4010_s5 + $0x78] sm:$0xff]  ;;  %v754_v35 = vld [vmem:[%s4010_s5 + $0x80] sm:$0xff]  ;;  %v2442_v36 = vpack.c.bf16 %v655_v34, %v654_v33  ;;  %v755_v37 = vld [vmem:[%s4010_s5 + $0x88] sm:$0xff] }
  0x2e   :  { %2422 = vmatpush1.bf16.msra.mxu0 %v2421_v57  ;;  %2450 = vmatprep.subr.bf16.mxu1 %v2785_v52  ;;  %v2466_v32 = vpack.c.bf16 %v753_v31, %v752_v29  ;;  %v2469_v38 = vpack.c.bf16 %v755_v37, %v754_v35  ;;  %v618_v42 = vld [vmem:[%s4041_s25] sm:$0x3]  ;;  %v839_v55 = vld [vmem:[%s4011_s6 + $0x8] sm:$0xff]  ;;  %v2106_v57 = vld [vmem:[%s4011_s6 + $0x50] sm:$0xff] }
  0x2f   :  { %2423 = vmatprep.subr.bf16.mxu0 %v2785_v52  ;;  %v623_v44 = vrot.slane %v618_v42, %v3178_v41  ;;  %v627_v47 = vrot.slane %v618_v42, %v3183_v43  ;;  %v838_v53 = vld [vmem:[%s4011_s6] sm:$0xff]  ;;  %v2105_v56 = vld [vmem:[%s4011_s6 + $0x48] sm:$0xff]  ;;  %v841_v8 = vld [vmem:[%s4011_s6 + $0x18] sm:$0xff] }
  0x30   :  { %v2484_v2 = vpack.c.bf16 %v839_v55, %v838_v53  ;;  %v2472_v3 = vpack.c.bf16 %v2106_v57, %v2105_v56  ;;  %v2108_v15 = vld [vmem:[%s4011_s6 + $0x60] sm:$0xff]  ;;  %v843_v18 = vld [vmem:[%s4011_s6 + $0x28] sm:$0xff]  ;;  %v2110_v21 = vld [vmem:[%s4011_s6 + $0x70] sm:$0xff] }
  0x31   :  { %2452 = vmatpush1.bf16.msra.mxu1 %v2451_v0  ;;  %v842_v17 = vld [vmem:[%s4011_s6 + $0x20] sm:$0xff]  ;;  %v844_v23 = vld [vmem:[%s4011_s6 + $0x30] sm:$0xff]  ;;  %v845_v24 = vld [vmem:[%s4011_s6 + $0x38] sm:$0xff] }
  0x32   :  { %2425 = vmatpush1.bf16.msra.mxu0 %v2424_v63  ;;  %2453 = vmatprep.subr.bf16.mxu1 %v2785_v52  ;;  %v2112_v27 = vld [vmem:[%s4011_s6 + $0x80] sm:$0xff]  ;;  %v2116_v42 = vld [vmem:[%s4011_s6 + $0x90] sm:$0xff]  ;;  %v2121_v53 = vld [vmem:[%s4011_s6 + $0xb8] sm:$0xff] }
  0x33   :  { %2426 = vmatprep.subr.bf16.mxu0 %v2785_v52  ;;  %v846_v29 = vld [vmem:[%s4011_s6 + $0x40] sm:$0xff]  ;;  %v2123_v56 = vld [vmem:[%s4011_s6 + $0xc8] sm:$0xff] }
  0x34   :  { %v2122_v55 = vld [vmem:[%s4011_s6 + $0xc0] sm:$0xff] }
  0x35   :  { %2455 = vmatpush1.bf16.msra.mxu1 %v2454_v6  ;;  %v840_v6 = vld [vmem:[%s4011_s6 + $0x10] sm:$0xff]  ;;  %v2505_v57 = vpack.c.bf16 %v2123_v56, %v2122_v55  ;;  %v1540_v55 = vld [vmem:[%s4015_s10 + $0x18] sm:$0xff]  ;;  %v1537_v56 = vld [vmem:[%s4015_s10] sm:$0xff] }
  0x36   :  { %2428 = vmatpush1.bf16.msra.mxu0 %v2427_v5  ;;  %2456 = vmatprep.subr.bf16.mxu1 %v2785_v52  ;;  %v2487_v12 = vpack.c.bf16 %v841_v8, %v840_v6  ;;  %v2133_v6 = vld [vmem:[%s4013_s8 + $0x130] sm:$0xff]  ;;  %v2229_v10 = vld [vmem:[%s4022_s17] ss:$0 sm:$0xff] }
  0x37   :  { %2429 = vmatprep.subr.bf16.mxu0 %v2785_v52 }
  0x39   :  { %2458 = vmatpush1.bf16.msra.mxu1 %v2457_v14  ;;  %v2107_v14 = vld [vmem:[%s4011_s6 + $0x58] sm:$0xff] }
  0x3a   :  { %2431 = vmatpush1.bf16.msra.mxu0 %v2430_v13  ;;  %2459 = vmatprep.subr.bf16.mxu1 %v2785_v52  ;;  %v2475_v16 = vpack.c.bf16 %v2108_v15, %v2107_v14  ;;  %v2137_v14 = vld [vmem:[%s4013_s8 + $0x150] sm:$0xff]  ;;  %v2140_v15 = vld [vmem:[%s4013_s8 + $0x168] sm:$0xff] }
  0x3b   :  { %2432 = vmatprep.subr.bf16.mxu0 %v2785_v52 }
  0x3d   :  { %2461 = vmatpush1.bf16.msra.mxu1 %v2460_v20  ;;  %v2109_v20 = vld [vmem:[%s4011_s6 + $0x68] sm:$0xff] }
  0x3e   :  { %2434 = vmatpush1.bf16.msra.mxu0 %v2433_v19  ;;  %2462 = vmatprep.subr.bf16.mxu1 %v2785_v52  ;;  %v2490_v19 = vpack.c.bf16 %v843_v18, %v842_v17  ;;  %v2478_v22 = vpack.c.bf16 %v2110_v21, %v2109_v20  ;;  %v2141_v20 = vld [vmem:[%s4013_s8 + $0x170] sm:$0xff]  ;;  %v2144_v21 = vld [vmem:[%s4013_s8 + $0x188] sm:$0xff] }
  0x3f   :  { %2435 = vmatprep.subr.bf16.mxu0 %v2785_v52 }
  0x41   :  { %2464 = vmatpush1.bf16.msra.mxu1 %v2463_v26  ;;  %v2111_v26 = vld [vmem:[%s4011_s6 + $0x78] sm:$0xff] }
  0x42   :  { %2437 = vmatpush1.bf16.msra.mxu0 %v2436_v25  ;;  %2465 = vmatprep.subr.bf16.mxu1 %v2785_v52  ;;  %v2493_v25 = vpack.c.bf16 %v845_v24, %v844_v23  ;;  %v2481_v28 = vpack.c.bf16 %v2112_v27, %v2111_v26  ;;  %v2145_v26 = vld [vmem:[%s4013_s8 + $0x190] sm:$0xff] }
  0x43   :  { %2438 = vmatprep.subr.bf16.mxu0 %v2785_v52 }
  0x45   :  { %2467 = vmatpush1.bf16.msra.mxu1 %v2466_v32 }
  0x46   :  { %2440 = vmatpush1.bf16.msra.mxu0 %v2439_v30  ;;  %2468 = vmatprep.subr.bf16.mxu1 %v2785_v52  ;;  %v2113_v30 = vld [vmem:[%s4011_s6 + $0x88] sm:$0xff] }
  0x47   :  { %2441 = vmatprep.subr.bf16.mxu0 %v2785_v52 }
  0x49   :  { %2470 = vmatpush1.bf16.msra.mxu1 %v2469_v38 }
  0x4a   :  { %2443 = vmatpush1.bf16.msra.mxu0 %v2442_v36  ;;  %2483 = vmatprep.subr.bf16.mxu1 %v2785_v52 }
  0x4b   :  { %2471 = vmatprep.subr.bf16.mxu0 %v2785_v52 }
  0xfa   :  { %v358_v45 = vpop.f32.mrb[0].mxu0  ;;  %v599_v46 = vpop.f32.mrb[0].mxu1 }
  0xfb   :  { %v614_v48 = vmax.f32 %v358_v45, %v599_v46  ;;  %v360_v49 = vpop.f32.mrb[1].mxu0  ;;  %v601_v50 = vpop.f32.mrb[1].mxu1 }
  0xfc   :  { %v615_v51 = vmax.f32 %v360_v49, %v601_v50 }
  0xfd   :  { %v630_v54 = vadd.f32 %v623_v44, %v614_v48  ;;  %v2119_v48 = vld [vmem:[%s4011_s6 + $0xa8] sm:$0xff] }
  0xfe   :  { %v631_v58 = vadd.f32 %v627_v47, %v615_v51  ;;  %v364_v59 = vpop.f32.mrb[2].mxu0  ;;  %v2120_v51 = vld [vmem:[%s4011_s6 + $0xb0] sm:$0xff] }
  0xff   :  { %v605_v60 = vpop.f32.mrb[2].mxu1  ;;  %v366_v62 = vpop.f32.mrb[3].mxu0  ;;  %v634_v4 = vmax.f32 %v630_v54, 0.0  ;;  %v2502_v54 = vpack.c.bf16 %v2121_v53, %v2120_v51 }
 0x100   :  { %v616_v61 = vmax.f32 %v364_v59, %v605_v60  ;;  %v607_v63 = vpop.f32.mrb[3].mxu1  ;;  %v635_v0 = vmax.f32 %v631_v58, 0.0  ;;  %v2124_v58 = vld [vmem:[%s4011_s6 + $0xd0] sm:$0xff]  ;;  %v2128_v60 = vld [vmem:[%s4013_s8 + $0x108] sm:$0xff] }
 0x101   :  { %v617_v1 = vmax.f32 %v366_v62, %v607_v63  ;;  %v2127_v63 = vld [vmem:[%s4013_s8 + $0x100] sm:$0xff] }
 0x102   :  { %v632_v5 = vadd.f32 %v623_v44, %v616_v61  ;;  %2101 = vmatprep.mubr.msk.f32.mxu0 %vm656_vm4, %v635_v0  ;;  %2103 = vmatprep.mubr.msk.f32.mxu1 %vm656_vm4, %v635_v0  ;;  %v2117_v44 = vld [vmem:[%s4011_s6 + $0x98] sm:$0xff]  ;;  %v2129_v0 = vld [vmem:[%s4013_s8 + $0x110] sm:$0xff] }
 0x103   :  { %v633_v9 = vadd.f32 %v627_v47, %v617_v1  ;;  %728 = vmatmul.mubr.f32.vlgmr.msra.gmra.mrb[4].mxu0 %v634_v4  ;;  %821 = vmatmul.mubr.f32.vlgmr.msra.gmra.mrb[4].mxu1 %v634_v4  ;;  %v2496_v46 = vpack.c.bf16 %v2117_v44, %v2116_v42  ;;  %v2118_v47 = vld [vmem:[%s4011_s6 + $0xa0] sm:$0xff]  ;;  %v2130_v61 = vld [vmem:[%s4013_s8 + $0x118] sm:$0xff]  ;;  %v2509_v1 = vpack.c.bf16 %v2129_v0, %v2127_v63 }
 0x104   :  { %2485 = vmatpush3.bf16.msra.mxu1 %v2484_v2  ;;  %2473 = vmatpush3.bf16.msra.mxu0 %v2472_v3  ;;  %v636_v13 = vmax.f32 %v632_v5, 0.0  ;;  %v2499_v50 = vpack.c.bf16 %v2119_v48, %v2118_v47  ;;  %v2507_v62 = vpack.c.bf16 %v2130_v61, %v2128_v60  ;;  %v2132_v2 = vld [vmem:[%s4013_s8 + $0x128] sm:$0xff]  ;;  %v2134_v3 = vld [vmem:[%s4013_s8 + $0x138] sm:$0xff]  ;;  %v2131_v5 = vld [vmem:[%s4013_s8 + $0x120] sm:$0xff] }
 0x105   :  { %v637_v11 = vmax.f32 %v633_v9, 0.0  ;;  %2486 = vmatprep.subr.bf16.mxu1 %v2785_v52  ;;  %2474 = vmatprep.subr.bf16.mxu0 %v2785_v52  ;;  %v2511_v4 = vpack.c.bf16 %v2134_v3, %v2132_v2  ;;  %v2513_v8 = vpack.c.bf16 %v2133_v6, %v2131_v5  ;;  %v2136_v9 = vld [vmem:[%s4013_s8 + $0x148] sm:$0xff]  ;;  %v2158_v42 = vld [vmem:[%s4013_s8 + $0x1f8] sm:$0xff]  ;;  %v2155_v44 = vld [vmem:[%s4013_s8 + $0x1e0] sm:$0xff] }
 0x106   :  { %v1100_v47 = vld [vmem:[%s4013_s8 + $0x8] sm:$0xff]  ;;  %v1102_v48 = vld [vmem:[%s4013_s8 + $0x18] sm:$0xff]  ;;  %v1541_v2 = vld [vmem:[%s4015_s10 + $0x20] sm:$0xff] }
 0x107   :  { %2102 = vmatprep.mubr.msk.f32.mxu0 %vm656_vm4, %v637_v11  ;;  %2104 = vmatprep.mubr.msk.f32.mxu1 %vm656_vm4, %v637_v11  ;;  %v2138_v11 = vld [vmem:[%s4013_s8 + $0x158] sm:$0xff]  ;;  %v1542_v60 = vld [vmem:[%s4015_s10 + $0x28] sm:$0xff]  ;;  %v1543_v3 = vld [vmem:[%s4015_s10 + $0x30] sm:$0xff] }
 0x108   :  { %733 = vmatmul.mubr.f32.gmra.mrb[6].mxu0 %v636_v13  ;;  %826 = vmatmul.mubr.f32.gmra.mrb[6].mxu1 %v636_v13  ;;  %v2515_v13 = vpack.c.bf16 %v2138_v11, %v2136_v9  ;;  %v1544_v61 = vld [vmem:[%s4015_s10 + $0x38] sm:$0xff]  ;;  %v2641_v6 = vpack.c.bf16 %v1543_v3, %v1541_v2  ;;  %v1545_v9 = vld [vmem:[%s4015_s10 + $0x40] sm:$0xff]  ;;  %v1547_v11 = vld [vmem:[%s4015_s10 + $0x50] sm:$0xff] }
 0x109   :  { %2488 = vmatpush3.bf16.msra.mxu1 %v2487_v12  ;;  %2476 = vmatpush3.bf16.msra.mxu0 %v2475_v16  ;;  %v2135_v12 = vld [vmem:[%s4013_s8 + $0x140] sm:$0xff]  ;;  %v2142_v16 = vld [vmem:[%s4013_s8 + $0x178] sm:$0xff]  ;;  %v1108_v3 = vld [vmem:[%s4013_s8 + $0x48] sm:$0xff] }
 0x10a   :  { %2489 = vmatprep.subr.bf16.mxu1 %v2785_v52  ;;  %2477 = vmatprep.subr.bf16.mxu0 %v2785_v52  ;;  %v2517_v17 = vpack.c.bf16 %v2137_v14, %v2135_v12  ;;  %v2519_v18 = vpack.c.bf16 %v2142_v16, %v2140_v15  ;;  %v1548_v5 = vld [vmem:[%s4015_s10 + $0x58] sm:$0xff]  ;;  %v1550_v12 = vld [vmem:[%s4015_s10 + $0x68] sm:$0xff]  ;;  %v2645_v14 = vpack.c.bf16 %v1547_v11, %v1545_v9  ;;  %v1549_v16 = vld [vmem:[%s4015_s10 + $0x60] sm:$0xff] }
 0x10b   :  { %2312 = vmatprep.mubr.msk.f32.mxu1 %vm2786_vm5, %v2783_v7  ;;  %2291 = vmatprep.mubr.msk.f32.mxu0 %vm2786_vm5, %v2783_v7  ;;  %v1573_v11 = vld [vmem:[%s4015_s10 + $0x120] sm:$0xff] }
 0x10d   :  { %2491 = vmatpush3.bf16.msra.mxu1 %v2490_v19  ;;  %2479 = vmatpush3.bf16.msra.mxu0 %v2478_v22  ;;  %v2139_v19 = vld [vmem:[%s4013_s8 + $0x160] sm:$0xff]  ;;  %v2146_v22 = vld [vmem:[%s4013_s8 + $0x198] sm:$0xff] }
 0x10e   :  { %2492 = vmatprep.subr.bf16.mxu1 %v2785_v52  ;;  %2480 = vmatprep.subr.bf16.mxu0 %v2785_v52  ;;  %v2521_v23 = vpack.c.bf16 %v2141_v20, %v2139_v19  ;;  %v2523_v24 = vpack.c.bf16 %v2146_v22, %v2144_v21  ;;  %v1556_v19 = vld [vmem:[%s4015_s10 + $0x98] sm:$0xff]  ;;  %v1553_v22 = vld [vmem:[%s4015_s10 + $0x80] sm:$0xff] }
 0x111   :  { %2494 = vmatpush3.bf16.msra.mxu1 %v2493_v25  ;;  %2482 = vmatpush3.bf16.msra.mxu0 %v2481_v28  ;;  %v2143_v25 = vld [vmem:[%s4013_s8 + $0x180] sm:$0xff]  ;;  %v2148_v28 = vld [vmem:[%s4013_s8 + $0x1a8] sm:$0xff] }
 0x112   :  { %2310 = vmatprep.subr.mxu1 %v2783_v7  ;;  %2289 = vmatprep.subr.mxu0 %v2783_v7  ;;  %v2525_v27 = vpack.c.bf16 %v2145_v26, %v2143_v25  ;;  %v1560_v25 = vld [vmem:[%s4015_s10 + $0xb8] sm:$0xff] }
 0x115   :  { %2311 = vmatpush3.msra.mxu1 %v846_v29  ;;  %2290 = vmatpush3.msra.mxu0 %v2113_v30  ;;  %v2150_v29 = vld [vmem:[%s4013_s8 + $0x1b8] sm:$0xff] }
 0x116   :  { %2495 = vmatprep.subr.bf16.mxu0 %v2785_v52  ;;  %2508 = vmatprep.subr.bf16.mxu1 %v2507_v62  ;;  %v2527_v30 = vpack.c.bf16 %v2150_v29, %v2148_v28  ;;  %v1557_v28 = vld [vmem:[%s4015_s10 + $0xa0] sm:$0xff]  ;;  %v1559_v29 = vld [vmem:[%s4015_s10 + $0xb0] sm:$0xff] }
 0x1d6   :  { %v729_v31 = vpop.f32.mrb[4].mxu0  ;;  %v822_v32 = vpop.f32.mrb[4].mxu1 }
 0x1d7   :  { %v831_v33 = vmax.f32 %v729_v31, %v822_v32  ;;  %v731_v34 = vpop.f32.mrb[5].mxu0  ;;  %v824_v35 = vpop.f32.mrb[5].mxu1  ;;  %v2147_v31 = vld [vmem:[%s4013_s8 + $0x1a0] sm:$0xff]  ;;  %v2149_v32 = vld [vmem:[%s4013_s8 + $0x1b0] sm:$0xff] }
 0x1d8   :  { %v2152_v34 = vld [vmem:[%s4013_s8 + $0x1c8] sm:$0xff]  ;;  %v2154_v35 = vld [vmem:[%s4013_s8 + $0x1d8] sm:$0xff] }
 0x1d9   :  { %834 = vst.msk [vmem:[#allocation2] sm:$0xff] %vm833_vm6, %v831_v33  ;;  %v2529_v33 = vpack.c.bf16 %v2149_v32, %v2147_v31  ;;  %v1564_v31 = vld [vmem:[%s4015_s10 + $0xd8] sm:$0xff] }
 0x1db   :  { %v734_v36 = vpop.f32.mrb[6].mxu0  ;;  %v827_v37 = vpop.f32.mrb[6].mxu1 }
 0x1dc   :  { %v832_v38 = vmax.f32 %v734_v36, %v827_v37  ;;  %v736_v39 = vpop.f32.mrb[7].mxu0  ;;  %v829_v40 = vpop.f32.mrb[7].mxu1  ;;  %v2531_v36 = vpack.c.bf16 %v2154_v35, %v2152_v34  ;;  %v2151_v37 = vld [vmem:[%s4013_s8 + $0x1c0] sm:$0xff] }
 0x1dd   :  { %v2156_v40 = vld [vmem:[%s4013_s8 + $0x1e8] sm:$0xff] }
 0x1de   :  { %836 = vst.msk [vmem:[#allocation2 + $0x8] sm:$0xf] %vm835_vm7, %v832_v38  ;;  %v2153_v38 = vld [vmem:[%s4013_s8 + $0x1d0] sm:$0xff] }
 0x1df   :  { %v2533_v39 = vpack.c.bf16 %v2153_v38, %v2151_v37  ;;  %v1561_v38 = vld [vmem:[%s4015_s10 + $0xc0] sm:$0xff] }
 0x1e0   :  { %v837_v45 = vld [vmem:[#allocation2] sm:$0xff] }
 0x1e1   :  { %2313 = vmatmul.mubr.msk.f32.vlgmr.msra.gmra.mrb[8].mxu1 %vm833_vm6, %v837_v45  ;;  %v2535_v45 = vpack.c.bf16 %v2158_v42, %v2156_v40  ;;  %v1566_v42 = vld [vmem:[%s4015_s10 + $0xe8] sm:$0xff] }
 0x1e2   :  { %1229 = vmatprep.mubr.f32.mxu1 %v2783_v7  ;;  %2510 = vmatpush1.bf16.msra.mxu1 %v2509_v1  ;;  %v2639_v1 = vpack.c.bf16 %v1544_v61, %v1542_v60  ;;  %v1571_v60 = vld [vmem:[%s4015_s10 + $0x110] sm:$0xff] }
 0x1e3   :  { %2512 = vmatprep.subr.bf16.mxu1 %v2511_v4  ;;  %v1546_v4 = vld [vmem:[%s4015_s10 + $0x48] sm:$0xff] }
 0x1e5   :  { %v847_v49 = vld [vmem:[#allocation2 + $0x2] sm:$0xff] }
 0x1e6   :  { %2292 = vmatmul.mubr.msk.f32.vlgmr.msra.gmra.mrb[8].mxu0 %vm833_vm6, %v847_v49  ;;  %v1004_v59 = vld [vmem:[#allocation2 + $0x4] sm:$0xff]  ;;  %2514 = vmatpush1.bf16.msra.mxu1 %v2513_v8  ;;  %v2643_v8 = vpack.c.bf16 %v1548_v5, %v1546_v4  ;;  %v1110_v4 = vld [vmem:[%s4013_s8 + $0x58] sm:$0xff] }
 0x1e7   :  { %2497 = vmatpush3.bf16.msra.mxu0 %v2496_v46  ;;  %2333 = vmatprep.mubr.msk.f32.mxu0 %vm2786_vm5, %v2783_v7  ;;  %v2157_v46 = vld [vmem:[%s4013_s8 + $0x1f0] sm:$0xff] }
 0x1e8   :  { %2498 = vmatprep.subr.bf16.mxu0 %v2785_v52  ;;  %2516 = vmatprep.subr.bf16.mxu1 %v2515_v13  ;;  %v2537_v49 = vpack.c.bf16 %v2157_v46, %v2155_v44  ;;  %v1552_v13 = vld [vmem:[%s4015_s10 + $0x78] sm:$0xff] }
 0x1e9   :  { %v2647_v15 = vpack.c.bf16 %v1552_v13, %v1550_v12  ;;  %v1568_v44 = vld [vmem:[%s4015_s10 + $0xf8] sm:$0xff]  ;;  %v1575_v12 = vld [vmem:[%s4015_s10 + $0x130] sm:$0xff]  ;;  %v2547_v13 = vpack.c.bf16 %v1110_v4, %v1108_v3  ;;  %v1127_v4 = vld [vmem:[%s4013_s8 + $0xe0] sm:$0xff] }
 0x1ea   :  { %2518 = vmatpush1.bf16.msra.mxu1 %v2517_v17  ;;  %v1551_v17 = vld [vmem:[%s4015_s10 + $0x70] sm:$0xff]  ;;  %v2663_v46 = vpack.c.bf16 %v1568_v44, %v1566_v42  ;;  %v1120_v42 = vld [vmem:[%s4013_s8 + $0xa8] sm:$0xff]  ;;  %v1122_v44 = vld [vmem:[%s4013_s8 + $0xb8] sm:$0xff] }
 0x1eb   :  { %2500 = vmatpush3.bf16.msra.mxu0 %v2499_v50  ;;  %2520 = vmatprep.subr.bf16.mxu1 %v2519_v18  ;;  %v2539_v50 = vpack.c.bf16 %v1102_v48, %v1100_v47  ;;  %v1554_v18 = vld [vmem:[%s4015_s10 + $0x88] sm:$0xff]  ;;  %v2649_v20 = vpack.c.bf16 %v1551_v17, %v1549_v16  ;;  %v1565_v47 = vld [vmem:[%s4015_s10 + $0xe0] sm:$0xff]  ;;  %v1567_v48 = vld [vmem:[%s4015_s10 + $0xf0] sm:$0xff] }
 0x1ec   :  { %2501 = vmatprep.subr.bf16.mxu0 %v2785_v52  ;;  %v2651_v21 = vpack.c.bf16 %v1556_v19, %v1554_v18  ;;  %v1580_v16 = vld [vmem:[%s4015_s10 + $0x158] sm:$0xff]  ;;  %v1112_v17 = vld [vmem:[%s4013_s8 + $0x68] sm:$0xff]  ;;  %v2673_v19 = vpack.c.bf16 %v1575_v12, %v1573_v11  ;;  %v2159_v12 = vld [vmem:[%s4013_s8 + $0x200] sm:$0xff] }
 0x1ed   :  { %v1114_v18 = vld [vmem:[%s4013_s8 + $0x78] sm:$0xff] }
 0x1ee   :  { %2522 = vmatpush1.bf16.msra.mxu1 %v2521_v23  ;;  %v1555_v23 = vld [vmem:[%s4015_s10 + $0x90] sm:$0xff] }
 0x1ef   :  { %2503 = vmatpush3.bf16.msra.mxu0 %v2502_v54  ;;  %2524 = vmatprep.subr.bf16.mxu1 %v2523_v24  ;;  %v1538_v54 = vld [vmem:[%s4015_s10 + $0x8] sm:$0xff]  ;;  %v2653_v26 = vpack.c.bf16 %v1555_v23, %v1553_v22  ;;  %v1577_v23 = vld [vmem:[%s4015_s10 + $0x140] sm:$0xff] }
 0x1f0   :  { %2504 = vmatprep.subr.bf16.mxu0 %v2785_v52  ;;  %v1558_v24 = vld [vmem:[%s4015_s10 + $0xa8] sm:$0xff] }
 0x1f2   :  { %2526 = vmatpush1.bf16.msra.mxu1 %v2525_v27  ;;  %v2655_v27 = vpack.c.bf16 %v1560_v25, %v1558_v24  ;;  %v1579_v24 = vld [vmem:[%s4015_s10 + $0x150] sm:$0xff]  ;;  %v2551_v25 = vpack.c.bf16 %v1114_v18, %v1112_v17  ;;  %v2163_v18 = vld [vmem:[%s4013_s8 + $0x220] sm:$0xff] }
 0x1f3   :  { %2506 = vmatpush3.bf16.msra.mxu0 %v2505_v57  ;;  %2528 = vmatprep.subr.bf16.mxu1 %v2527_v30  ;;  %v1562_v30 = vld [vmem:[%s4015_s10 + $0xc8] sm:$0xff] }
 0x1f4   :  { %2331 = vmatprep.subr.mxu0 %v2783_v7  ;;  %v2659_v37 = vpack.c.bf16 %v1564_v31, %v1562_v30  ;;  %v1118_v30 = vld [vmem:[%s4013_s8 + $0x98] sm:$0xff]  ;;  %v2677_v31 = vpack.c.bf16 %v1579_v24, %v1577_v23 }
 0x1f6   :  { %2530 = vmatpush1.bf16.msra.mxu1 %v2529_v33  ;;  %v2126_v33 = vld [vmem:[%s4012_s7] ss:$0 sm:$0xff] }
 0x1f7   :  { %2332 = vmatpush3.msra.mxu0 %v2124_v58  ;;  %2532 = vmatprep.subr.bf16.mxu1 %v2531_v36  ;;  %v2635_v58 = vpack.c.bf16 %v1540_v55, %v1538_v54  ;;  %v2657_v36 = vpack.c.bf16 %v1559_v29, %v1557_v28  ;;  %v1570_v54 = vld [vmem:[%s4015_s10 + $0x108] sm:$0xff]  ;;  %v1572_v55 = vld [vmem:[%s4015_s10 + $0x118] sm:$0xff] }
 0x1f8   :  { %2334 = vmatmul.mubr.msk.f32.vlgmr.msra.gmra.mrb[10].mxu0 %vm833_vm6, %v1004_v59  ;;  %v1539_v59 = vld [vmem:[%s4015_s10 + $0x10] sm:$0xff]  ;;  %v1584_v28 = vld [vmem:[%s4015_s10 + $0x178] sm:$0xff]  ;;  %v1116_v29 = vld [vmem:[%s4013_s8 + $0x88] sm:$0xff] }
 0x1f9   :  { %v2637_v0 = vpack.c.bf16 %v1539_v59, %v1537_v56  ;;  %2636 = vmatprep.subr.bf16.mxu0 %v2635_v58  ;;  %v2665_v56 = vpack.c.bf16 %v1567_v48, %v1565_v47  ;;  %v1103_v58 = vld [vmem:[%s4013_s8 + $0x20] sm:$0xff] }
 0x1fa   :  { %2534 = vmatpush1.bf16.msra.mxu1 %v2533_v39  ;;  %v1563_v39 = vld [vmem:[%s4015_s10 + $0xd0] sm:$0xff]  ;;  %v1569_v59 = vld [vmem:[%s4015_s10 + $0x100] sm:$0xff] }
 0x1fb   :  { %2536 = vmatprep.subr.bf16.mxu1 %v2535_v45  ;;  %2638 = vmatpush1.bf16.msra.mxu0 %v2637_v0  ;;  %v2661_v45 = vpack.c.bf16 %v1563_v39, %v1561_v38  ;;  %v1574_v0 = vld [vmem:[%s4015_s10 + $0x128] sm:$0xff]  ;;  %v2669_v5 = vpack.c.bf16 %v1571_v60, %v1569_v59  ;;  %v1117_v38 = vld [vmem:[%s4013_s8 + $0x90] sm:$0xff]  ;;  %v1119_v47 = vld [vmem:[%s4013_s8 + $0xa0] sm:$0xff] }
 0x1fc   :  { %2640 = vmatprep.subr.bf16.mxu0 %v2639_v1  ;;  %v1576_v1 = vld [vmem:[%s4015_s10 + $0x138] sm:$0xff]  ;;  %v1586_v39 = vld [vmem:[%s4015_s10 + $0x188] sm:$0xff] }
 0x1fd   :  { %v2671_v9 = vpack.c.bf16 %v1576_v1, %v1574_v0  ;;  %v1128_v0 = vld [vmem:[%s4013_s8 + $0xe8] sm:$0xff]  ;;  %v1130_v1 = vld [vmem:[%s4013_s8 + $0xf8] sm:$0xff] }
 0x1fe   :  { %2538 = vmatpush1.bf16.msra.mxu1 %v2537_v49  ;;  %v1099_v49 = vld [vmem:[%s4013_s8] sm:$0xff]  ;;  %v2567_v3 = vpack.c.bf16 %v1130_v1, %v1128_v0  ;;  %v2193_v1 = vld [vmem:[%s4013_s8 + $0x310] sm:$0xff] }
 0x1ff   :  { %2540 = vmatprep.subr.bf16.mxu1 %v2539_v50  ;;  %2642 = vmatpush1.bf16.msra.mxu0 %v2641_v6  ;;  %v1101_v50 = vld [vmem:[%s4013_s8 + $0x10] sm:$0xff]  ;;  %v2191_v0 = vld [vmem:[%s4013_s8 + $0x300] sm:$0xff] }
 0x200   :  { %2644 = vmatprep.subr.bf16.mxu0 %v2643_v8  ;;  %v1107_v8 = vld [vmem:[%s4013_s8 + $0x40] sm:$0xff] }
 0x203   :  { %2646 = vmatpush1.bf16.msra.mxu0 %v2645_v14  ;;  %v1109_v14 = vld [vmem:[%s4013_s8 + $0x50] sm:$0xff] }
 0x204   :  { %2648 = vmatprep.subr.bf16.mxu0 %v2647_v15  ;;  %v1578_v15 = vld [vmem:[%s4015_s10 + $0x148] sm:$0xff] }
 0x205   :  { %v2675_v22 = vpack.c.bf16 %v1580_v16, %v1578_v15  ;;  %v2166_v15 = vld [vmem:[%s4013_s8 + $0x238] sm:$0xff] }
 0x207   :  { %2650 = vmatpush1.bf16.msra.mxu0 %v2649_v20  ;;  %v2549_v20 = vpack.c.bf16 %v1109_v14, %v1107_v8  ;;  %v2162_v8 = vld [vmem:[%s4013_s8 + $0x218] sm:$0xff]  ;;  %v2164_v14 = vld [vmem:[%s4013_s8 + $0x228] sm:$0xff] }
 0x208   :  { %2652 = vmatprep.subr.bf16.mxu0 %v2651_v21  ;;  %v1111_v21 = vld [vmem:[%s4013_s8 + $0x60] sm:$0xff]  ;;  %v2575_v17 = vpack.c.bf16 %v2166_v15, %v2164_v14 }
 0x209   :  { %v2199_v15 = vld [vmem:[%s4013_s8 + $0x340] sm:$0xff] }
 0x20b   :  { %2654 = vmatpush1.bf16.msra.mxu0 %v2653_v26  ;;  %v1113_v26 = vld [vmem:[%s4013_s8 + $0x70] sm:$0xff] }
 0x20c   :  { %2656 = vmatprep.subr.bf16.mxu0 %v2655_v27  ;;  %v1582_v27 = vld [vmem:[%s4015_s10 + $0x168] sm:$0xff] }
 0x20f   :  { %2658 = vmatpush1.bf16.msra.mxu0 %v2657_v36  ;;  %v1583_v36 = vld [vmem:[%s4015_s10 + $0x170] sm:$0xff] }
 0x210   :  { %2660 = vmatprep.subr.bf16.mxu0 %v2659_v37  ;;  %v2555_v37 = vpack.c.bf16 %v1118_v30, %v1116_v29 }
 0x213   :  { %2662 = vmatpush1.bf16.msra.mxu0 %v2661_v45 }
 0x214   :  { %2664 = vmatprep.subr.bf16.mxu0 %v2663_v46 }
 0x217   :  { %2666 = vmatpush1.bf16.msra.mxu0 %v2665_v56  ;;  %v1124_v56 = vld [vmem:[%s4013_s8 + $0xc8] sm:$0xff] }
 0x2b4   :  { %v1000_v51 = vpop.f32.mrb[8].mxu1 }
 0x2b5   :  { %v2314_v53 = vpop.f32.mrb[9].mxu1 }
 0x2b6   :  { %v1106_v53 = vld [vmem:[%s4013_s8 + $0x38] sm:$0xff] }
 0x2b9   :  { %v927_v57 = vpop.f32.mrb[8].mxu0 }
 0x2ba   :  { %v1001_v62 = vadd.f32 %v1000_v51, %v927_v57  ;;  %v2293_v63 = vpop.f32.mrb[9].mxu0  ;;  %v1104_v51 = vld [vmem:[%s4013_s8 + $0x28] sm:$0xff]  ;;  %v2541_v57 = vpack.c.bf16 %v1101_v50, %v1099_v49  ;;  %v1585_v49 = vld [vmem:[%s4015_s10 + $0x180] sm:$0xff]  ;;  %v1587_v50 = vld [vmem:[%s4015_s10 + $0x190] sm:$0xff] }
 0x2bb   :  { %v2543_v61 = vpack.c.bf16 %v1106_v53, %v1104_v51  ;;  %v2667_v63 = vpack.c.bf16 %v1572_v55, %v1570_v54  ;;  %v2559_v51 = vpack.c.bf16 %v1122_v44, %v1120_v42  ;;  %v1121_v53 = vld [vmem:[%s4013_s8 + $0xb0] sm:$0xff]  ;;  %v1590_v54 = vld [vmem:[%s4015_s10 + $0x1a8] sm:$0xff]  ;;  %v1592_v55 = vld [vmem:[%s4015_s10 + $0x1b8] sm:$0xff] }
 0x2bc   :  { %v2561_v59 = vpack.c.bf16 %v1121_v53, %v1119_v47  ;;  %v2687_v60 = vpack.c.bf16 %v1592_v55, %v1590_v54  ;;  %v2184_v47 = vld [vmem:[%s4013_s8 + $0x2c8] sm:$0xff]  ;;  %v2185_v53 = vld [vmem:[%s4013_s8 + $0x2d0] sm:$0xff]  ;;  %v2190_v55 = vld [vmem:[%s4013_s8 + $0x2f8] sm:$0xff] }
 0x2bd   :  { %2668 = vmatprep.subr.bf16.mxu0 %v2667_v63  ;;  %v1125_v63 = vld [vmem:[%s4013_s8 + $0xd0] sm:$0xff]  ;;  %v2188_v54 = vld [vmem:[%s4013_s8 + $0x2e8] sm:$0xff] }
 0x2be   :  { %2670 = vmatpush1.bf16.msra.mxu0 %v2669_v5  ;;  %v1129_v5 = vld [vmem:[%s4013_s8 + $0xf0] sm:$0xff] }
 0x2bf   :  { %2672 = vmatprep.subr.bf16.mxu0 %v2671_v9  ;;  %v2569_v9 = vpack.c.bf16 %v1129_v5, %v1127_v4  ;;  %v2605_v4 = vpack.c.bf16 %v2193_v1, %v2191_v0 }
 0x2c2   :  { %2674 = vmatpush1.bf16.msra.mxu0 %v2673_v19  ;;  %v2165_v19 = vld [vmem:[%s4013_s8 + $0x230] sm:$0xff] }
 0x2c3   :  { %2676 = vmatprep.subr.bf16.mxu0 %v2675_v22  ;;  %v2170_v22 = vld [vmem:[%s4013_s8 + $0x258] sm:$0xff]  ;;  %v2577_v23 = vpack.c.bf16 %v2165_v19, %v2163_v18 }
 0x2c4   :  { %v2206_v18 = vld [vmem:[%s4013_s8 + $0x378] sm:$0xff] }
 0x2c6   :  { %2678 = vmatpush1.bf16.msra.mxu0 %v2677_v31  ;;  %v2171_v31 = vld [vmem:[%s4013_s8 + $0x260] sm:$0xff] }
 0x2cb   :  { %v1084_v32 = vpop.f32.mrb[10].mxu0 }
 0x2cc   :  { %v1088_v34 = vadd.f32 %v1084_v32, %v1001_v62  ;;  %v2335_v35 = vpop.f32.mrb[11].mxu0  ;;  %v1105_v62 = vld [vmem:[%s4013_s8 + $0x30] sm:$0xff]  ;;  %v2553_v32 = vpack.c.bf16 %v1113_v26, %v1111_v21  ;;  %v2168_v21 = vld [vmem:[%s4013_s8 + $0x248] sm:$0xff] }
 0x2cd   :  { %v2545_v6 = vpack.c.bf16 %v1105_v62, %v1103_v58  ;;  %v1581_v35 = vld [vmem:[%s4015_s10 + $0x160] sm:$0xff]  ;;  %v2685_v58 = vpack.c.bf16 %v1587_v50, %v1585_v49  ;;  %v2579_v24 = vpack.c.bf16 %v2170_v22, %v2168_v21  ;;  %v2169_v26 = vld [vmem:[%s4013_s8 + $0x250] sm:$0xff] }
 0x2ce   :  { %v1096_v40 = vadd.f32 %v2126_v33, %v1088_v34  ;;  %v1115_v33 = vld [vmem:[%s4013_s8 + $0x80] sm:$0xff]  ;;  %v2679_v34 = vpack.c.bf16 %v1584_v28, %v1582_v27  ;;  %v2681_v45 = vpack.c.bf16 %v1583_v36, %v1581_v35  ;;  %v2172_v27 = vld [vmem:[%s4013_s8 + $0x268] sm:$0xff]  ;;  %v2174_v28 = vld [vmem:[%s4013_s8 + $0x278] sm:$0xff] }
 0x2cf   :  { %v2557_v46 = vpack.c.bf16 %v1117_v38, %v1115_v33  ;;  %v1123_v62 = vld [vmem:[%s4013_s8 + $0xc0] sm:$0xff]  ;;  %v2583_v30 = vpack.c.bf16 %v2174_v28, %v2172_v27  ;;  %v2176_v33 = vld [vmem:[%s4013_s8 + $0x288] sm:$0xff]  ;;  %v2177_v38 = vld [vmem:[%s4013_s8 + $0x290] sm:$0xff] }
 0x2d0   :  { %1097 = vst [vmem:[#allocation3] sm:$0xff] %v1096_v40  ;;  %v1588_v40 = vld [vmem:[%s4015_s10 + $0x198] sm:$0xff]  ;;  %2680 = vmatprep.subr.bf16.mxu0 %v2679_v34  ;;  %v2203_v21 = vld [vmem:[%s4013_s8 + $0x360] sm:$0xff]  ;;  %v2205_v22 = vld [vmem:[%s4013_s8 + $0x370] sm:$0xff] }
 0x2d1   :  { %v2683_v48 = vpack.c.bf16 %v1588_v40, %v1586_v39  ;;  %2682 = vmatpush1.bf16.msra.mxu0 %v2681_v45  ;;  %v2178_v34 = vld [vmem:[%s4013_s8 + $0x298] sm:$0xff]  ;;  %v2180_v39 = vld [vmem:[%s4013_s8 + $0x2a8] sm:$0xff]  ;;  %v2179_v45 = vld [vmem:[%s4013_s8 + $0x2a0] sm:$0xff] }
 0x2d2   :  { %v2587_v36 = vpack.c.bf16 %v2178_v34, %v2176_v33  ;;  %v2182_v40 = vld [vmem:[%s4013_s8 + $0x2b8] sm:$0xff]  ;;  %v2207_v27 = vld [vmem:[%s4013_s8 + $0x380] sm:$0xff]  ;;  %v2209_v28 = vld [vmem:[%s4013_s8 + $0x390] sm:$0xff] }
 0x2d3   :  { %2684 = vmatprep.subr.bf16.mxu0 %v2683_v48  ;;  %v2591_v44 = vpack.c.bf16 %v2182_v40, %v2180_v39  ;;  %v2186_v48 = vld [vmem:[%s4013_s8 + $0x2d8] sm:$0xff]  ;;  %v2211_v33 = vld [vmem:[%s4013_s8 + $0x3a0] sm:$0xff]  ;;  %v2213_v34 = vld [vmem:[%s4013_s8 + $0x3b0] sm:$0xff] }
 0x2d4   :  { %v2595_v50 = vpack.c.bf16 %v2186_v48, %v2184_v47  ;;  %v2215_v39 = vld [vmem:[%s4013_s8 + $0x3c0] sm:$0xff]  ;;  %v2217_v40 = vld [vmem:[%s4013_s8 + $0x3d0] sm:$0xff] }
 0x2d5   :  { %2686 = vmatpush1.bf16.msra.mxu0 %v2685_v58  ;;  %v2187_v58 = vld [vmem:[%s4013_s8 + $0x2e0] sm:$0xff]  ;;  %v2221_v48 = vld [vmem:[%s4013_s8 + $0x3f0] sm:$0xff] }
 0x2d6   :  { %2688 = vmatprep.subr.bf16.mxu0 %v2687_v60  ;;  %v2192_v60 = vld [vmem:[%s4013_s8 + $0x308] sm:$0xff]  ;;  %v2219_v47 = vld [vmem:[%s4013_s8 + $0x3e0] sm:$0xff] }
 0x2d7   :  { %v1131_v2 = vld [vmem:[#allocation3 + $0x2] sm:$0x3] }
 0x2d8   :  { %1230 = vmatmul.mubr.f32.vlgmr.msra.gmra.mrb[10].mxu1 %v1131_v2  ;;  %v2565_v2 = vpack.c.bf16 %v1125_v63, %v1123_v62 }
 0x2d9   :  { %2542 = vmatpush1.bf16.msra.mxu1 %v2541_v57  ;;  %1300 = vmatprep.mubr.f32.mxu1 %v2783_v7  ;;  %v1126_v57 = vld [vmem:[%s4013_s8 + $0xd8] sm:$0xff] }
 0x2da   :  { %2544 = vmatprep.subr.bf16.mxu1 %v2543_v61  ;;  %v2563_v61 = vpack.c.bf16 %v1126_v57, %v1124_v56  ;;  %v2599_v57 = vpack.c.bf16 %v2190_v55, %v2188_v54  ;;  %v1594_v55 = vld [vmem:[%s4015_s10 + $0x1c8] sm:$0xff] }
 0x2dd   :  { %2546 = vmatpush1.bf16.msra.mxu1 %v2545_v6  ;;  %v2160_v6 = vld [vmem:[%s4013_s8 + $0x208] sm:$0xff] }
 0x2de   :  { %2548 = vmatprep.subr.bf16.mxu1 %v2547_v13  ;;  %v2571_v11 = vpack.c.bf16 %v2162_v8, %v2160_v6  ;;  %v2161_v13 = vld [vmem:[%s4013_s8 + $0x210] sm:$0xff]  ;;  %v2195_v6 = vld [vmem:[%s4013_s8 + $0x320] sm:$0xff] }
 0x2df   :  { %v2573_v16 = vpack.c.bf16 %v2161_v13, %v2159_v12  ;;  %v2197_v8 = vld [vmem:[%s4013_s8 + $0x330] sm:$0xff]  ;;  %v2202_v12 = vld [vmem:[%s4013_s8 + $0x358] sm:$0xff] }
 0x2e0   :  { %v2609_v13 = vpack.c.bf16 %v2197_v8, %v2195_v6 }
 0x2e1   :  { %2550 = vmatpush1.bf16.msra.mxu1 %v2549_v20  ;;  %v1098_v20 = vld [vmem:[#allocation3] sm:$0x3] }
 0x2e2   :  { %2552 = vmatprep.subr.bf16.mxu1 %v2551_v25  ;;  %v2167_v25 = vld [vmem:[%s4013_s8 + $0x240] sm:$0xff] }
 0x2e3   :  { %v2581_v29 = vpack.c.bf16 %v2169_v26, %v2167_v25  ;;  %v2617_v25 = vpack.c.bf16 %v2205_v22, %v2203_v21  ;;  %v1695_v21 = vld [vmem:[%s4017_s12 + $0x48] sm:$0xff] }
 0x2e5   :  { %2554 = vmatpush1.bf16.msra.mxu1 %v2553_v32  ;;  %v2173_v32 = vld [vmem:[%s4013_s8 + $0x270] sm:$0xff] }
 0x2e6   :  { %2556 = vmatprep.subr.bf16.mxu1 %v2555_v37  ;;  %v2585_v35 = vpack.c.bf16 %v2173_v32, %v2171_v31  ;;  %v2175_v37 = vld [vmem:[%s4013_s8 + $0x280] sm:$0xff]  ;;  %v2621_v31 = vpack.c.bf16 %v2209_v28, %v2207_v27  ;;  %v1699_v27 = vld [vmem:[%s4017_s12 + $0x68] sm:$0xff] }
 0x2e7   :  { %v2589_v42 = vpack.c.bf16 %v2177_v38, %v2175_v37  ;;  %v2625_v37 = vpack.c.bf16 %v2213_v34, %v2211_v33  ;;  %v1703_v33 = vld [vmem:[%s4017_s12 + $0x88] sm:$0xff] }
 0x2e9   :  { %2558 = vmatpush1.bf16.msra.mxu1 %v2557_v46  ;;  %v2181_v46 = vld [vmem:[%s4013_s8 + $0x2b0] sm:$0xff] }
 0x2ea   :  { %2560 = vmatprep.subr.bf16.mxu1 %v2559_v51  ;;  %v2593_v49 = vpack.c.bf16 %v2181_v46, %v2179_v45  ;;  %v2183_v51 = vld [vmem:[%s4013_s8 + $0x2c0] sm:$0xff]  ;;  %v2629_v45 = vpack.c.bf16 %v2217_v40, %v2215_v39 }
 0x2eb   :  { %v2597_v56 = vpack.c.bf16 %v2185_v53, %v2183_v51  ;;  %v1589_v51 = vld [vmem:[%s4015_s10 + $0x1a0] sm:$0xff]  ;;  %v1591_v53 = vld [vmem:[%s4015_s10 + $0x1b0] sm:$0xff] }
 0x2ec   :  { %v2689_v54 = vpack.c.bf16 %v1591_v53, %v1589_v51  ;;  %v1597_v39 = vld [vmem:[%s4016_s11] sm:$0x3] }
 0x2ed   :  { %2562 = vmatpush1.bf16.msra.mxu1 %v2561_v59  ;;  %v2189_v59 = vld [vmem:[%s4013_s8 + $0x2f0] sm:$0xff]  ;;  %v1602_v40 = vrot.slane %v1597_v39, %v3178_v41 }
 0x2ee   :  { %2564 = vmatprep.subr.bf16.mxu1 %v2563_v61  ;;  %v2194_v61 = vld [vmem:[%s4013_s8 + $0x318] sm:$0xff]  ;;  %v2601_v62 = vpack.c.bf16 %v2189_v59, %v2187_v58  ;;  %2690 = vmatpush1.bf16.msra.mxu0 %v2689_v54  ;;  %v1593_v58 = vld [vmem:[%s4015_s10 + $0x1c0] sm:$0xff]  ;;  %v1595_v59 = vld [vmem:[%s4015_s10 + $0x1d0] sm:$0xff] }
 0x2ef   :  { %v2603_v63 = vpack.c.bf16 %v2194_v61, %v2192_v60  ;;  %v2693_v60 = vpack.c.bf16 %v1595_v59, %v1593_v58  ;;  %v1521_v61 = vld [vmem:[%s4014_s9] sm:$0x3] }
 0x2f0   :  { %v2226_v59 = vld [vmem:[%s4020_s15] ss:$0 sm:$0xff] }
 0x2f1   :  { %2566 = vmatpush1.bf16.msra.mxu1 %v2565_v2  ;;  %v2196_v2 = vld [vmem:[%s4013_s8 + $0x328] sm:$0xff] }
 0x2f2   :  { %2568 = vmatprep.subr.bf16.mxu1 %v2567_v3  ;;  %v2198_v3 = vld [vmem:[%s4013_s8 + $0x338] sm:$0xff] }
 0x2f3   :  { %v2607_v5 = vpack.c.bf16 %v2198_v3, %v2196_v2  ;;  %v1686_v3 = vld [vmem:[%s4017_s12] sm:$0xff] }
 0x2f5   :  { %2570 = vmatpush1.bf16.msra.mxu1 %v2569_v9  ;;  %v1307_v9 = vld [vmem:[#allocation3 + $0x4] sm:$0x3] }
 0x2f6   :  { %2572 = vmatprep.subr.bf16.mxu1 %v2571_v11  ;;  %v2200_v11 = vld [vmem:[%s4013_s8 + $0x348] sm:$0xff] }
 0x2f7   :  { %v2611_v14 = vpack.c.bf16 %v2202_v12, %v2200_v11  ;;  %v1688_v11 = vld [vmem:[%s4017_s12 + $0x10] sm:$0xff]  ;;  %v1689_v12 = vld [vmem:[%s4017_s12 + $0x18] sm:$0xff] }
 0x2f8   :  { %1301 = vmatmul.mubr.f32.vlgmr.msra.gmra.mrb[10].mxu1 %v1098_v20 }
 0x2f9   :  { %2574 = vmatpush1.bf16.msra.mxu1 %v2573_v16  ;;  %1405 = vmatprep.mubr.f32.mxu1 %v2783_v7  ;;  %v2201_v16 = vld [vmem:[%s4013_s8 + $0x350] sm:$0xff] }
 0x2fa   :  { %2576 = vmatprep.subr.bf16.mxu1 %v2575_v17  ;;  %v2204_v17 = vld [vmem:[%s4013_s8 + $0x368] sm:$0xff]  ;;  %v2613_v19 = vpack.c.bf16 %v2201_v16, %v2199_v15 }
 0x2fb   :  { %v2615_v20 = vpack.c.bf16 %v2206_v18, %v2204_v17  ;;  %v1691_v15 = vld [vmem:[%s4017_s12 + $0x28] sm:$0xff]  ;;  %v1692_v17 = vld [vmem:[%s4017_s12 + $0x30] sm:$0xff]  ;;  %v1693_v18 = vld [vmem:[%s4017_s12 + $0x38] sm:$0xff] }
 0x2fd   :  { %2578 = vmatpush1.bf16.msra.mxu1 %v2577_v23  ;;  %v2208_v23 = vld [vmem:[%s4013_s8 + $0x388] sm:$0xff] }
 0x2fe   :  { %2580 = vmatprep.subr.bf16.mxu1 %v2579_v24  ;;  %v2210_v24 = vld [vmem:[%s4013_s8 + $0x398] sm:$0xff] }
 0x2ff   :  { %v2619_v26 = vpack.c.bf16 %v2210_v24, %v2208_v23  ;;  %v1696_v23 = vld [vmem:[%s4017_s12 + $0x50] sm:$0xff]  ;;  %v1697_v24 = vld [vmem:[%s4017_s12 + $0x58] sm:$0xff] }
 0x301   :  { %2582 = vmatpush1.bf16.msra.mxu1 %v2581_v29  ;;  %v2212_v29 = vld [vmem:[%s4013_s8 + $0x3a8] sm:$0xff] }
 0x302   :  { %2584 = vmatprep.subr.bf16.mxu1 %v2583_v30  ;;  %v2214_v30 = vld [vmem:[%s4013_s8 + $0x3b8] sm:$0xff] }
 0x303   :  { %v2623_v32 = vpack.c.bf16 %v2214_v30, %v2212_v29  ;;  %v1700_v29 = vld [vmem:[%s4017_s12 + $0x70] sm:$0xff]  ;;  %v1701_v30 = vld [vmem:[%s4017_s12 + $0x78] sm:$0xff] }
 0x305   :  { %2586 = vmatpush1.bf16.msra.mxu1 %v2585_v35  ;;  %v2216_v35 = vld [vmem:[%s4013_s8 + $0x3c8] sm:$0xff] }
 0x306   :  { %2588 = vmatprep.subr.bf16.mxu1 %v2587_v36  ;;  %v2218_v36 = vld [vmem:[%s4013_s8 + $0x3d8] sm:$0xff] }
 0x307   :  { %v2627_v38 = vpack.c.bf16 %v2218_v36, %v2216_v35  ;;  %v1704_v35 = vld [vmem:[%s4017_s12 + $0x90] sm:$0xff]  ;;  %v1705_v36 = vld [vmem:[%s4017_s12 + $0x98] sm:$0xff] }
 0x309   :  { %2590 = vmatpush1.bf16.msra.mxu1 %v2589_v42  ;;  %v2220_v42 = vld [vmem:[%s4013_s8 + $0x3e8] sm:$0xff] }
 0x30a   :  { %2592 = vmatprep.subr.bf16.mxu1 %v2591_v44  ;;  %v2222_v44 = vld [vmem:[%s4013_s8 + $0x3f8] sm:$0xff] }
 0x30b   :  { %v2631_v46 = vpack.c.bf16 %v2222_v44, %v2220_v42  ;;  %v1606_v42 = vrot.slane %v1597_v39, %v3183_v43 }
 0x30d   :  { %2594 = vmatpush1.bf16.msra.mxu1 %v2593_v49  ;;  %v2633_v49 = vpack.c.bf16 %v2221_v48, %v2219_v47  ;;  %v1788_v47 = vld [vmem:[%s4019_s14] sm:$0xff]  ;;  %v1789_v48 = vld [vmem:[%s4019_s14 + $0x8] sm:$0xff] }
 0x30e   :  { %2596 = vmatprep.subr.bf16.mxu1 %v2595_v50  ;;  %v1414_v50 = vld [vmem:[#allocation3 + $0x6] sm:$0x3]  ;;  %v2726_v51 = vpack.c.bf16 %v1789_v48, %v1788_v47 }
 0x311   :  { %2598 = vmatpush1.bf16.msra.mxu1 %v2597_v56  ;;  %v1596_v56 = vld [vmem:[%s4015_s10 + $0x1d8] sm:$0xff] }
 0x312   :  { %2600 = vmatprep.subr.bf16.mxu1 %v2599_v57  ;;  %v2691_v57 = vpack.c.bf16 %v1596_v56, %v1594_v55 }
 0x314   :  { %2692 = vmatprep.subr.bf16.mxu0 %v2691_v57  ;;  %v1876_v57 = vld [vmem:[%s4021_s16] sm:$0xff] }
 0x315   :  { %2602 = vmatpush1.bf16.msra.mxu1 %v2601_v62  ;;  %2694 = vmatpush1.bf16.msra.mxu0 %v2693_v60  ;;  %v1526_v62 = vrot.slane %v1521_v61, %v3178_v41  ;;  %v1790_v41 = vld [vmem:[%s4019_s14 + $0x10] sm:$0xf] }
 0x316   :  { %2604 = vmatprep.subr.bf16.mxu1 %v2603_v63  ;;  %2695 = vmatprep.subr.bf16.mxu0 %v2785_v52  ;;  %v1530_v63 = vrot.slane %v1521_v61, %v3183_v43  ;;  %v2224_v43 = vld [vmem:[%s4018_s13] ss:$0 sm:$0xff] }
 0x318   :  { %1406 = vmatmul.mubr.f32.vlgmr.msra.gmra.mrb[10].mxu1 %v1307_v9 }
 0x319   :  { %2606 = vmatpush1.bf16.msra.mxu1 %v2605_v4  ;;  %1512 = vmatprep.mubr.f32.mxu1 %v2783_v7  ;;  %v1687_v4 = vld [vmem:[%s4017_s12 + $0x8] sm:$0xff] }
 0x31a   :  { %2608 = vmatprep.subr.bf16.mxu1 %v2607_v5  ;;  %v2696_v8 = vpack.c.bf16 %v1687_v4, %v1686_v3  ;;  %v2232_v4 = vld [vmem:[%s4024_s19] ss:$0 sm:$0xff] }
 0x31d   :  { %2610 = vmatpush1.bf16.msra.mxu1 %v2609_v13  ;;  %v2699_v13 = vpack.c.bf16 %v1689_v12, %v1688_v11 }
 0x31e   :  { %2612 = vmatprep.subr.bf16.mxu1 %v2611_v14  ;;  %v1690_v14 = vld [vmem:[%s4017_s12 + $0x20] sm:$0xff] }
 0x31f   :  { %v2702_v16 = vpack.c.bf16 %v1691_v15, %v1690_v14 }
 0x321   :  { %2614 = vmatpush1.bf16.msra.mxu1 %v2613_v19  ;;  %v2705_v19 = vpack.c.bf16 %v1693_v18, %v1692_v17 }
 0x322   :  { %2616 = vmatprep.subr.bf16.mxu1 %v2615_v20  ;;  %v1694_v20 = vld [vmem:[%s4017_s12 + $0x40] sm:$0xff] }
 0x323   :  { %v2708_v22 = vpack.c.bf16 %v1695_v21, %v1694_v20 }
 0x325   :  { %2618 = vmatpush1.bf16.msra.mxu1 %v2617_v25  ;;  %v2711_v25 = vpack.c.bf16 %v1697_v24, %v1696_v23 }
 0x326   :  { %2620 = vmatprep.subr.bf16.mxu1 %v2619_v26  ;;  %v1698_v26 = vld [vmem:[%s4017_s12 + $0x60] sm:$0xff] }
 0x327   :  { %v2714_v28 = vpack.c.bf16 %v1699_v27, %v1698_v26 }
 0x329   :  { %2622 = vmatpush1.bf16.msra.mxu1 %v2621_v31  ;;  %v2717_v31 = vpack.c.bf16 %v1701_v30, %v1700_v29 }
 0x32a   :  { %2624 = vmatprep.subr.bf16.mxu1 %v2623_v32  ;;  %v1702_v32 = vld [vmem:[%s4017_s12 + $0x80] sm:$0xff] }
 0x32b   :  { %v2720_v34 = vpack.c.bf16 %v1703_v33, %v1702_v32 }
 0x32d   :  { %2626 = vmatpush1.bf16.msra.mxu1 %v2625_v37  ;;  %v2723_v37 = vpack.c.bf16 %v1705_v36, %v1704_v35 }
 0x32e   :  { %2628 = vmatprep.subr.bf16.mxu1 %v2627_v38  ;;  %v1706_v38 = vld [vmem:[%s4017_s12 + $0xa0] sm:$0xff] }
 0x331   :  { %2630 = vmatpush1.bf16.msra.mxu1 %v2629_v45 }
 0x332   :  { %2632 = vmatprep.subr.bf16.mxu1 %v2631_v46 }
 0x335   :  { %2634 = vmatpush1.bf16.msra.mxu1 %v2633_v49 }
 0x336   :  { %2352 = vmatprep.subr.mxu1 %v2783_v7 }
 0x338   :  { %1513 = vmatmul.mubr.f32.vlgmr.msra.gmra.mrb[10].mxu1 %v1414_v50 }
 0x339   :  { %2354 = vmatprep.mubr.msk.f32.mxu1 %vm2786_vm5, %v2783_v7 }
 0x40b   :  { %v1514_v0 = vpop.f32.mrb[10].mxu1 }
 0x40c   :  { %v1533_v1 = vadd.f32 %v1526_v62, %v1514_v0  ;;  %v1516_v2 = vpop.f32.mrb[11].mxu1 }
 0x40d   :  { %v1534_v5 = vadd.f32 %v1530_v63, %v1516_v2  ;;  %v1963_v63 = vld [vmem:[%s4023_s18] sm:$0xff]  ;;  %s2759_s18 = scalar_lea.vmem %s2054_s3, 32 }
 0x40e   :  { %v1535_v9 = vmax.f32 %v1533_v1, 0.0  ;;  %2353 = vmatpush3.msra.mxu1 %v1963_v63  ;;  %p2760_p0 = scmp.ne.s32.totalorder %s2054_s3, %s2759_s18  ;;  %p2765_p2 = scmp.lt.s32.totalorder %s2759_s18, %s2759_s18 }
 0x40f   :  { %v1536_v6 = vmax.f32 %v1534_v5, 0.0 }
 0x410   :  { %p2766_p3 = por %p2765_p2, %p2764_p1 }
 0x411   :  { %2223 = vmatprep.mubr.msk.f32.mxu0 %vm1609_vm8, %v1536_v6 }
 0x412   :  { %1678 = vmatmul.mubr.f32.vlgmr.msra.gmra.mrb[12].mxu0 %v1535_v9  ;;  %p2767_p4 = pnand %p2766_p3, %p2760_p0 }
 0x413   :  { %2697 = vmatpush1.bf16.msra.mxu0 %v2696_v8 }
 0x414   :  { %2698 = vmatprep.subr.bf16.mxu0 %v2785_v52 }
 0x417   :  { %2700 = vmatpush1.bf16.msra.mxu0 %v2699_v13 }
 0x418   :  { %2701 = vmatprep.subr.bf16.mxu0 %v2785_v52 }
 0x41b   :  { %2703 = vmatpush1.bf16.msra.mxu0 %v2702_v16 }
 0x41c   :  { %2704 = vmatprep.subr.bf16.mxu0 %v2785_v52 }
 0x41f   :  { %2706 = vmatpush1.bf16.msra.mxu0 %v2705_v19 }
 0x420   :  { %2707 = vmatprep.subr.bf16.mxu0 %v2785_v52 }
 0x423   :  { %2709 = vmatpush1.bf16.msra.mxu0 %v2708_v22 }
 0x424   :  { %2710 = vmatprep.subr.bf16.mxu0 %v2785_v52 }
 0x427   :  { %2712 = vmatpush1.bf16.msra.mxu0 %v2711_v25 }
 0x428   :  { %2713 = vmatprep.subr.bf16.mxu0 %v2785_v52 }
 0x42b   :  { %2715 = vmatpush1.bf16.msra.mxu0 %v2714_v28 }
 0x42c   :  { %2716 = vmatprep.subr.bf16.mxu0 %v2785_v52 }
 0x42f   :  { %2718 = vmatpush1.bf16.msra.mxu0 %v2717_v31 }
 0x430   :  { %2719 = vmatprep.subr.bf16.mxu0 %v2785_v52 }
 0x433   :  { %2721 = vmatpush1.bf16.msra.mxu0 %v2720_v34 }
 0x434   :  { %2722 = vmatprep.subr.bf16.mxu0 %v2785_v52 }
 0x437   :  { %2724 = vmatpush1.bf16.msra.mxu0 %v2723_v37 }
 0x438   :  { %1758 = vmatprep.subr.mxu0 %v2783_v7 }
 0x43b   :  { %1759 = vmatpush1.msra.mxu0 %v1706_v38 }
 0x43c   :  { %2725 = vmatprep.subr.bf16.mxu0 %v2785_v52 }
 0x4e5   :  { %v1679_v44 = vpop.f32.mrb[12].mxu0 }
 0x4e6   :  { %v1680_v45 = vadd.f32 %v1679_v44, %v1602_v40  ;;  %v1681_v46 = vpop.f32.mrb[13].mxu0 }
 0x4e7   :  { %v1682_v49 = vadd.f32 %v1681_v46, %v1606_v42 }
 0x4e8   :  { %v1684_v53 = vmax.f32 %v1680_v45, 0.0 }
 0x4e9   :  { %v1685_v50 = vmax.f32 %v1682_v49, 0.0 }
 0x4eb   :  { %2225 = vmatprep.mubr.msk.f32.mxu0 %vm1714_vm9, %v1685_v50 }
 0x4ec   :  { %1783 = vmatmul.mubr.f32.vlgmr.msra.gmra.mrb[14].mxu0 %v1684_v53 }
 0x4ed   :  { %2727 = vmatpush3.bf16.msra.mxu0 %v2726_v51  ;;  %2342 = vmatprep.mubr.msk.f32.mxu0 %vm2786_vm5, %v2783_v7 }
 0x4ee   :  { %2340 = vmatprep.subr.mxu0 %v2783_v7 }
 0x4f1   :  { %2341 = vmatpush3.msk.msra.mxu0 %vm107_vm0, %v1790_v41 }
 0x4f2   :  { %2728 = vmatprep.subr.bf16.mxu0 %v2785_v52  ;;  %v1877_v52 = vld [vmem:[%s4021_s16 + $0x8] sm:$0xf] }
 0x4f3   :  { %v2729_v58 = vpack.c.bf16 %v1877_v52, %v1876_v57 }
 0x5bf   :  { %v1784_v54 = vpop.f32.mrb[14].mxu0 }
 0x5c0   :  { %v1785_v55 = vadd.f32 %v2224_v43, %v1784_v54  ;;  %v1786_v56 = vpop.f32.mrb[15].mxu0 }
 0x5c2   :  { %2343 = vmatmul.mubr.msk.f32.vlgmr.msra.gmra.mrb[16].mxu0 %vm1798_vm10, %v1785_v55 }
 0x5c3   :  { %2349 = vmatprep.mubr.msk.f32.mxu0 %vm2786_vm5, %v2783_v7  ;;  %2731 = vmatpush3.bf16.msk.msra.mxu0 %vm2914_vm2, %v2729_v58 }
 0x695   :  { %v1871_v60 = vpop.f32.mrb[16].mxu0 }
 0x696   :  { %v1872_v61 = vadd.f32 %v2226_v59, %v1871_v60  ;;  %v2344_v62 = vpop.f32.mrb[17].mxu0 }
 0x698   :  { %v1875_v7 = vmax.f32 %v1872_v61, 0.0 }
 0x69a   :  { %2350 = vmatmul.mubr.msk.f32.vlgmr.msra.gmra.mrb[18].mxu0 %vm1885_vm11, %v1875_v7 }
 0x76d   :  { %v1958_v0 = vpop.f32.mrb[18].mxu0 }
 0x76e   :  { %v1959_v1 = vadd.f32 %v2229_v10, %v1958_v0  ;;  %v2351_v2 = vpop.f32.mrb[19].mxu0 }
 0x770   :  { %v1962_v3 = vmax.f32 %v1959_v1, 0.0 }
 0x772   :  { %2355 = vmatmul.mubr.msk.f32.vlgmr.msra.gmra.mrb[12].mxu1 %vm1971_vm12, %v1962_v3 }
 0x845   :  { %v2041_v5 = vpop.f32.mrb[12].mxu1 }
 0x846   :  { %v2042_v6 = vadd.f32 %v2232_v4, %v2041_v5  ;;  %v2356_v8 = vpop.f32.mrb[13].mxu1 }
 0x848   :  { %2046 = vst.msk [vmem:[#allocation4] sm:$0x3] %vm2045_vm13, %v2042_v6 }
 0x849   :  { %2770 = shalt.err (!%p2767_p4)
}
 0x84a   :  { %s2771_s22 = scalar_lea.hbm %s4025_s20, 32 }
 0x84b   :  { %p2772_p5 = scmp.ne.s32.totalorder %s4025_s20, %s2771_s22  ;;  %p2775_p6 = scmp.lt.u32.totalorder %s2771_s22, %s4025_s20 }
 0x84d   :  { %p2777_p7 = pnand %p2775_p6, %p2772_p5 }
 0x84f   :  { %2780 = shalt.err (!%p2777_p7)
}
 0x850   :  { %2056 = dma.vmem_to_hbm [thread:$0]  %s2054_s3, 32, %s4025_s20, [#allocation5]  }
 0x851   :  { %2781 = dma.done.wait [#allocation5], 32  }
 0x852   :  { %2782 = vsyncadd [#allocation5], 4294967264 }
 0x853   :  { %2060 = vsyncpa [#allocation5], 1 }

</bundles_post_ra>
